<compile_context>
chip_gen: v7x
topology: tpu7x:2x2x1
jax: 0.10.0
libtpu: 0.0.40
codegen_flags: <defaults>
</compile_context>

<pallas_src>
import functools

import jax
import jax.numpy as jnp
import numpy as np
from jax import lax
from jax.experimental import pallas as pl
from jax.experimental.pallas import tpu as pltpu

_LANE = 128


def _cdiv(a, b):
    return -(-a // b)


def _round_up(x, m):
    return ((x + m - 1) // m) * m


def _sublane_quantum(dtype):
    itemsize = jnp.dtype(dtype).itemsize
    return 8 if itemsize >= 4 else 8 * (4 // itemsize)


def _tversky_gdice_kernel(prob_ref, label_ref, out_ref, *,
                          alpha, beta, ch_rows, rows_blk, bps,
                          r_valid_rows, label_is_ids, needs_tail_mask, unroll):
    # prob_ref : (1, C, rows_blk, 128) VMEM tile (native dtype).
    # label_ref: (1, C, rows_blk, 128) one-hot  OR  (1, rows_blk, 128) int32 ids.
    # out_ref  : (1, 1, 3, C-1, ch_rows, 128) f32; its block index does not
    #            depend on the spatial grid axis, so it stays resident in VMEM
    #            across the whole reduction and acts as the per-(n, split)
    #            accumulator (written back to HBM when (n, split) changes).
    C = prob_ref.shape[1]
    lane = prob_ref.shape[3]
    Cm1 = C - 1
    num_chunks = rows_blk // ch_rows

    sp = pl.program_id(1)
    s = pl.program_id(2)

    two_a = 2.0 * alpha
    two_b = 2.0 * beta
    fm_lin = 1.0 - two_a - two_b
    # Default Tversky parameters collapse final_mask to pm + l - pm*l.
    special = (alpha == 0.5) and (beta == 0.5)

    def run_block(masked):
        if masked:
            row_base = (sp * bps + s) * rows_blk
            row_iota = lax.broadcasted_iota(jnp.int32, (ch_rows, lane), 0)

        def chunk_body(j, carry):
            r0 = pl.multiple_of(j * ch_rows, ch_rows)
            if masked:
                vmask = (row_base + j * ch_rows + row_iota) < r_valid_rows
            # All prob channels of this chunk: the channel-wise max is pure
            # elementwise VPU work thanks to the spatially dense layout.
            p = []
            for c in range(C):
                pc = prob_ref[0, c, pl.ds(r0, ch_rows), :].astype(jnp.float32)
                if masked:
                    pc = jnp.where(vmask, pc, 0.0)
                p.append(pc)
            mx = p[0]
            for c in range(1, C):
                mx = jnp.maximum(mx, p[c])
            if label_is_ids:
                cls = label_ref[0, pl.ds(r0, ch_rows), :]

            acc = list(carry)
            not_found = jnp.ones((ch_rows, lane), jnp.float32)
            for c in range(C):
                pc = p[c]
                # First-occurrence one-hot of the channel argmax (matches
                # torch.argmax tie behaviour) via a running "not found" mask.
                pm = jnp.where(pc == mx, not_found, 0.0)
                not_found = not_found - pm
                if c == 0:
                    continue                     # background excluded from loss
                if label_is_ids:
                    lc = jnp.where(cls == c, 1.0, 0.0)
                else:
                    lc = label_ref[0, c, pl.ds(r0, ch_rows), :].astype(jnp.float32)
                if masked:
                    lc = jnp.where(vmask, lc, 0.0)
                if special:
                    fm = pm + lc - pm * lc
                else:
                    fm = pm * (lc * fm_lin + two_a) + two_b * lc
                i = c - 1
                acc[i] = acc[i] + pc * lc                     # sum(p * l)
                acc[Cm1 + i] = acc[Cm1 + i] + lc              # sum(l) -> weight
                acc[2 * Cm1 + i] = acc[2 * Cm1 + i] + (pc + lc) * fm
            return tuple(acc)

        zero = jnp.zeros((ch_rows, lane), jnp.float32)
        res = lax.fori_loop(0, num_chunks, chunk_body,
                            tuple(zero for _ in range(3 * Cm1)),
                            unroll=unroll)

        # Fold this block's vreg-carried partials into the resident output
        # accumulator once per grid step (no per-chunk VMEM RMW traffic).
        @pl.when(s == 0)
        def _set():
            for i in range(Cm1):
                out_ref[0, 0, 0, i] = res[i]
                out_ref[0, 0, 1, i] = res[Cm1 + i]
                out_ref[0, 0, 2, i] = res[2 * Cm1 + i]

        @pl.when(s != 0)
        def _add():
            for i in range(Cm1):
                out_ref[0, 0, 0, i] += res[i]
                out_ref[0, 0, 1, i] += res[Cm1 + i]
                out_ref[0, 0, 2, i] += res[2 * Cm1 + i]

    if needs_tail_mask:
        block_start = (sp * bps + s) * rows_blk
        is_full = (block_start + rows_blk) <= r_valid_rows
        has_valid = block_start < r_valid_rows

        @pl.when(is_full)
        def _full():
            run_block(masked=False)

        @pl.when(jnp.logical_and(has_valid, jnp.logical_not(is_full)))
        def _partial():
            run_block(masked=True)
        # Fully out-of-range blocks (possible only for the trailing split when
        # the block count was rounded up) are skipped entirely.
    else:
        run_block(masked=False)


def tversky_gdice_loss(prob, label, *, alpha=0.5, beta=0.5, num_splits=2,
                       target_block_bytes=2 * 1024 * 1024):
    """Pallas TPU implementation of TverskyGDiceLoss.forward. Returns (N,).

    prob : (N, C, D, H, W) float tensor (consumed natively, cast to f32 in
           the kernel).
    label: either a one-hot / soft label tensor with the same shape as `prob`
           (any dtype; bf16/int8 one-hot from the caller cuts label HBM
           traffic) or integer class ids of shape (N, D, H, W) (cheapest: the
           one-hot is rebuilt on the fly inside the kernel).
    num_splits: spatial core-split factor (2 keeps both v7x TensorCores busy
           when N is small; harmless on single-core chips).
    """
    N, C, D, H, W = prob.shape
    if C < 2:
        raise ValueError("need at least 2 channels (background + foreground)")
    S = D * H * W

    label_is_ids = (label.ndim == 4)
    if label_is_ids:
        if label.shape != (N, D, H, W):
            raise ValueError("class-id label must have shape (N, D, H, W)")
        if label.dtype != jnp.int32:
            label = label.astype(jnp.int32)
    else:
        if label.shape != prob.shape:
            raise ValueError("one-hot label must have the same shape as prob")

    R = _cdiv(S, _LANE)

    # Sublane quantum (packed dtypes tile more rows per (x, 128) tile).
    rq = _sublane_quantum(prob.dtype)
    if not label_is_ids:
        rq = max(rq, _sublane_quantum(label.dtype))

    # Block sizing: big enough to amortise per-grid-step overhead, small
    # enough that 2 inputs x 2 pipeline buffers stay well below every chip's
    # VMEM limit (v5e/v6e 128 MiB, v7x 64 MiB physical / 32 MiB scoped).
    bytes_per_row = C * _LANE * prob.dtype.itemsize
    bytes_per_row += (_LANE * 4) if label_is_ids else (C * _LANE * label.dtype.itemsize)
    max_rows = min(1024, max(rq, target_block_bytes // bytes_per_row))
    max_rows -= max_rows % rq
    max_rows = max(max_rows, rq)

    # Spatial block count derived from the actual R (bounded padding), plus a
    # leading split axis so both v7x TensorCores get work even when N == 1.
    nsplit = num_splits if (num_splits > 1 and R >= 64) else 1
    bps = max(1, _cdiv(_cdiv(R, nsplit), max_rows))
    rows_blk = _round_up(_cdiv(R, nsplit * bps), rq)
    if nsplit > 1 and (nsplit - 1) * bps * rows_blk >= R:
        # Degenerate split (one core would get no valid rows) -> no split.
        nsplit = 1
        bps = max(1, _cdiv(R, max_rows))
        rows_blk = _round_up(_cdiv(R, bps), rq)
    nb = nsplit * bps
    r_cover = nb * rows_blk

    # Layout: (N, C, rows, 128).  If S is lane-aligned and the block fits in
    # R we skip jnp.pad entirely (no full HBM read+write copy) and mask the
    # ragged tail rows inside the kernel instead.
    pad_free = (S % _LANE == 0) and (rows_blk <= R)
    if pad_free:
        r_rows = R
        needs_tail_mask = (r_cover != R)
        p = prob.reshape(N, C, R, _LANE)
        lab = (label.reshape(N, R, _LANE) if label_is_ids
               else label.reshape(N, C, R, _LANE))
    else:
        # TODO(synk): a flat-layout kernel with in-kernel lane masking would
        # avoid this full pad copy when S % 128 != 0 as well.
        r_rows = r_cover
        needs_tail_mask = False
        s_pad = r_rows * _LANE
        p = jnp.pad(prob.reshape(N, C, S), ((0, 0), (0, 0), (0, s_pad - S)))
        p = p.reshape(N, C, r_rows, _LANE)
        if label_is_ids:
            lab = jnp.pad(label.reshape(N, S), ((0, 0), (0, s_pad - S)))
            lab = lab.reshape(N, r_rows, _LANE)
        else:
            lab = jnp.pad(label.reshape(N, C, S),
                          ((0, 0), (0, 0), (0, s_pad - S)))
            lab = lab.reshape(N, C, r_rows, _LANE)

    # Chunk height inside the block: 16 rows (2 f32 vregs) when the vreg
    # budget allows, the dtype quantum otherwise (ch_rows=8 for large C).
    if rq >= 16:
        ch_rows = rq
    elif C < 12 and rows_blk % 16 == 0:
        ch_rows = 16
    else:
        ch_rows = 8
    num_chunks = rows_blk // ch_rows
    unroll = 2 if (num_chunks >= 2 and num_chunks % 2 == 0) else 1

    nb_valid = _cdiv(r_rows, rows_blk)      # blocks containing any valid row
    clamp_blocks = nb > nb_valid            # rare rounding pathology only
    Cm1 = C - 1

    def blk_idx(sp_i, s_i):
        b = sp_i * bps + s_i
        if clamp_blocks:
            b = jnp.minimum(b, nb_valid - 1)
        return b

    if label_is_ids:
        lab_spec = pl.BlockSpec((1, rows_blk, _LANE),
                                lambda n, sp_i, s_i: (n, blk_idx(sp_i, s_i), 0))
    else:
        lab_spec = pl.BlockSpec((1, C, rows_blk, _LANE),
                                lambda n, sp_i, s_i: (n, 0, blk_idx(sp_i, s_i), 0))

    parts = pl.pallas_call(
        functools.partial(
            _tversky_gdice_kernel,
            alpha=alpha, beta=beta, ch_rows=ch_rows, rows_blk=rows_blk,
            bps=bps, r_valid_rows=r_rows, label_is_ids=label_is_ids,
            needs_tail_mask=needs_tail_mask, unroll=unroll),
        out_shape=jax.ShapeDtypeStruct((N, nsplit, 3, Cm1, ch_rows, _LANE),
                                       jnp.float32),
        grid_spec=pltpu.PrefetchScalarGridSpec(
            num_scalar_prefetch=0,
            grid=(N, nsplit, bps),
            in_specs=[
                pl.BlockSpec((1, C, rows_blk, _LANE),
                             lambda n, sp_i, s_i: (n, 0, blk_idx(sp_i, s_i), 0)),
                lab_spec,
            ],
            # Output block index is independent of the spatial axis -> it
            # stays resident across the whole reduction (per-(n, split)
            # accumulator) and is written back when (n, split) changes.
            out_specs=pl.BlockSpec(
                (1, 1, 3, Cm1, ch_rows, _LANE),
                lambda n, sp_i, s_i: (n, sp_i, 0, 0, 0, 0)),
        ),
        compiler_params=pltpu.CompilerParams(
            dimension_semantics=("parallel", "parallel", "arbitrary"),
            vmem_limit_bytes=32 * 1024 * 1024,
        ),
    )(p, lab)

    # Tiny epilogue in plain JAX: combine per-(batch, split) partials, apply
    # the channel weights and form the scalar loss.
    sums = parts.sum(axis=(1, 4, 5))        # (N, 3, C-1)
    u, lsum, d = sums[:, 0], sums[:, 1], sums[:, 2]
    w = 1.0 / (lsum * lsum + 1.0)
    num = (u * w).sum(axis=1)
    den = (d * w).sum(axis=1)
    return 1.0 - 2.0 * (num / den)


def _reference_loss(prob, label, alpha=0.5, beta=0.5):
    """Pure-JAX reference mirroring the PyTorch forward exactly."""
    N, C, D, H, W = prob.shape
    pm_idx = jnp.argmax(prob, axis=1)                           # (N, D, H, W)
    prob_mask = jax.nn.one_hot(pm_idx, C, dtype=label.dtype)    # (N, D, H, W, C)
    prob_mask = jnp.moveaxis(prob_mask, 4, 1).reshape(N, C, -1)
    union = (prob * label).reshape(N, C, -1)
    prob_r = prob.reshape(N, C, -1)
    label_r = label.reshape(N, C, -1)
    TP = prob_mask * label_r
    FP = prob_mask * (1 - label_r) * 2 * alpha
    FN = (1 - prob_mask) * label_r * 2 * beta
    final_mask = TP + FP + FN
    weight = 1.0 / (label_r.sum(axis=2) ** 2 + 1.0)
    num = (union.sum(axis=2) * weight)[:, 1:].sum(axis=1)
    den = (((prob_r * final_mask).sum(axis=2)
            + (label_r * final_mask).sum(axis=2)) * weight)[:, 1:].sum(axis=1)
    return 1.0 - 2.0 * (num / den)


if __name__ == "__main__":
    def make_case(key, N, C, D, H, W):
        k1, k2 = jax.random.split(key)
        logits = jax.random.normal(k1, (N, C, D, H, W), dtype=jnp.float32)
        prob = jax.nn.softmax(logits, axis=1)
        cls = jax.random.randint(k2, (N, D, H, W), 0, C)
        onehot = jnp.moveaxis(jax.nn.one_hot(cls, C, dtype=jnp.float32), 4, 1)
        return prob, onehot, cls

    # Case 1: S % 128 == 0, R = 65 -> no jnp.pad, core split + masked tail.
    prob, onehot, cls = make_case(jax.random.PRNGKey(0), 2, 4, 13, 16, 40)
    ref = _reference_loss(prob, onehot, alpha=0.5, beta=0.5)
    out = tversky_gdice_loss(prob, onehot, alpha=0.5, beta=0.5)
    jax.block_until_ready(out)
    np.testing.assert_allclose(np.asarray(out), np.asarray(ref),
                               rtol=1e-4, atol=1e-5)

    # Case 2: integer class-id labels (reduced label HBM traffic path).
    out_ids = tversky_gdice_loss(prob, cls, alpha=0.5, beta=0.5)
    jax.block_until_ready(out_ids)
    np.testing.assert_allclose(np.asarray(out_ids), np.asarray(ref),
                               rtol=1e-4, atol=1e-5)

    # Case 3: tiny shape exercising the bounded-pad fallback path.
    prob3, onehot3, _ = make_case(jax.random.PRNGKey(1), 2, 4, 4, 8, 8)
    ref3 = _reference_loss(prob3, onehot3, alpha=0.5, beta=0.5)
    out3 = tversky_gdice_loss(prob3, onehot3, alpha=0.5, beta=0.5)
    jax.block_until_ready(out3)
    np.testing.assert_allclose(np.asarray(out3), np.asarray(ref3),
                               rtol=1e-4, atol=1e-5)

    print("KERNEL_OK")
</pallas_src>

<mosaic_0001>
module attributes {stable_mosaic.version = 11 : i64} {
  func.func @_tversky_gdice_kernel(%arg0: i32, %arg1: i32, %arg2: i32, %arg3: memref<1x4x40x128xf32, #tpu.memory_space<vmem>>, %arg4: memref<1x4x40x128xf32, #tpu.memory_space<vmem>>, %arg5: memref<1x1x3x3x8x128xf32, #tpu.memory_space<vmem>>) attributes {dimension_semantics = [#tpu.dimension_semantics<parallel>, #tpu.dimension_semantics<parallel>, #tpu.dimension_semantics<arbitrary>], iteration_bounds = array<i64: 2, 2, 1>, scalar_prefetch = 0 : i64, scratch_operands = 0 : i64, tpu.core_type = #tpu.core_type<tc>, window_params = [{transform_indices = @transform_0, window_bounds = array<i64: 1, 4, 40, 128>}, {transform_indices = @transform_1, window_bounds = array<i64: 1, 4, 40, 128>}, {transform_indices = @transform_2, window_bounds = array<i64: 1, 1, 3, 3, 8, 128>}]} {
    %c1_i32 = arith.constant 1 : i32
    %0 = arith.muli %arg1, %c1_i32 : i32
    %1 = arith.addi %0, %arg2 : i32
    %c40_i32 = arith.constant 40 : i32
    %2 = arith.muli %1, %c40_i32 : i32
    %c40_i32_0 = arith.constant 40 : i32
    %3 = arith.addi %2, %c40_i32_0 : i32
    %c65_i32 = arith.constant 65 : i32
    %4 = arith.cmpi sle, %3, %c65_i32 : i32
    %c65_i32_1 = arith.constant 65 : i32
    %5 = arith.cmpi slt, %2, %c65_i32_1 : i32
    %6 = arith.extui %4 : i1 to i32
    %c0_i32 = arith.constant 0 : i32
    %7 = arith.cmpi ne, %6, %c0_i32 : i32
    scf.if %7 {
      %cst = arith.constant 0.000000e+00 : f32
      %12 = vector.broadcast %cst : f32 to vector<8x128xf32>
      %c0_i32_3 = arith.constant 0 : i32
      %c5_i32 = arith.constant 5 : i32
      %13 = arith.addi %c0_i32_3, %c5_i32 : i32
      %c1_i32_4 = arith.constant 1 : i32
      %14:9 = scf.for %arg6 = %c0_i32_3 to %13 step %c1_i32_4 iter_args(%arg7 = %12, %arg8 = %12, %arg9 = %12, %arg10 = %12, %arg11 = %12, %arg12 = %12, %arg13 = %12, %arg14 = %12, %arg15 = %12) -> (vector<8x128xf32>, vector<8x128xf32>, vector<8x128xf32>, vector<8x128xf32>, vector<8x128xf32>, vector<8x128xf32>, vector<8x128xf32>, vector<8x128xf32>, vector<8x128xf32>)  : i32 {
        %c8_i32 = arith.constant 8 : i32
        %21 = arith.muli %arg6, %c8_i32 : i32
        %22 = tpu.assume_multiple %21, 8 : i32
        %c0 = arith.constant 0 : index
        %c0_10 = arith.constant 0 : index
        %23 = arith.index_cast %22 : i32 to index
        %c0_11 = arith.constant 0 : index
        %24 = vector.load %arg3[%c0, %c0_10, %23, %c0_11] : memref<1x4x40x128xf32, #tpu.memory_space<vmem>>, vector<1x1x8x128xf32>
        %25 = vector.shape_cast %24 : vector<1x1x8x128xf32> to vector<8x128xf32>
        %c0_12 = arith.constant 0 : index
        %c1 = arith.constant 1 : index
        %26 = arith.index_cast %22 : i32 to index
        %c0_13 = arith.constant 0 : index
        %27 = vector.load %arg3[%c0_12, %c1, %26, %c0_13] : memref<1x4x40x128xf32, #tpu.memory_space<vmem>>, vector<1x1x8x128xf32>
        %28 = vector.shape_cast %27 : vector<1x1x8x128xf32> to vector<8x128xf32>
        %c0_14 = arith.constant 0 : index
        %c2 = arith.constant 2 : index
        %29 = arith.index_cast %22 : i32 to index
        %c0_15 = arith.constant 0 : index
        %30 = vector.load %arg3[%c0_14, %c2, %29, %c0_15] : memref<1x4x40x128xf32, #tpu.memory_space<vmem>>, vector<1x1x8x128xf32>
        %31 = vector.shape_cast %30 : vector<1x1x8x128xf32> to vector<8x128xf32>
        %c0_16 = arith.constant 0 : index
        %c3 = arith.constant 3 : index
        %32 = arith.index_cast %22 : i32 to index
        %c0_17 = arith.constant 0 : index
        %33 = vector.load %arg3[%c0_16, %c3, %32, %c0_17] : memref<1x4x40x128xf32, #tpu.memory_space<vmem>>, vector<1x1x8x128xf32>
        %34 = vector.shape_cast %33 : vector<1x1x8x128xf32> to vector<8x128xf32>
        %35 = arith.maximumf %25, %28 : vector<8x128xf32>
        %36 = arith.maximumf %35, %31 : vector<8x128xf32>
        %37 = arith.maximumf %36, %34 : vector<8x128xf32>
        %cst_18 = arith.constant 1.000000e+00 : f32
        %38 = vector.broadcast %cst_18 : f32 to vector<8x128xf32>
        %39 = arith.cmpf oeq, %25, %37 : vector<8x128xf32>
        %cst_19 = arith.constant 0.000000e+00 : f32
        %40 = vector.broadcast %cst_19 : f32 to vector<8x128xf32>
        %41 = arith.select %39, %38, %40 : vector<8x128xi1>, vector<8x128xf32>
        %42 = arith.subf %38, %41 : vector<8x128xf32>
        %43 = arith.cmpf oeq, %28, %37 : vector<8x128xf32>
        %cst_20 = arith.constant 0.000000e+00 : f32
        %44 = vector.broadcast %cst_20 : f32 to vector<8x128xf32>
        %45 = arith.select %43, %42, %44 : vector<8x128xi1>, vector<8x128xf32>
        %46 = arith.subf %42, %45 : vector<8x128xf32>
        %c0_21 = arith.constant 0 : index
        %c1_22 = arith.constant 1 : index
        %47 = arith.index_cast %22 : i32 to index
        %c0_23 = arith.constant 0 : index
        %48 = vector.load %arg4[%c0_21, %c1_22, %47, %c0_23] : memref<1x4x40x128xf32, #tpu.memory_space<vmem>>, vector<1x1x8x128xf32>
        %49 = vector.shape_cast %48 : vector<1x1x8x128xf32> to vector<8x128xf32>
        %50 = arith.addf %45, %49 : vector<8x128xf32>
        %51 = arith.mulf %45, %49 : vector<8x128xf32>
        %52 = arith.subf %50, %51 : vector<8x128xf32>
        %53 = arith.mulf %28, %49 : vector<8x128xf32>
        %54 = arith.addf %arg7, %53 : vector<8x128xf32>
        %55 = arith.addf %arg10, %49 : vector<8x128xf32>
        %56 = arith.addf %28, %49 : vector<8x128xf32>
        %57 = arith.mulf %56, %52 : vector<8x128xf32>
        %58 = arith.addf %arg13, %57 : vector<8x128xf32>
        %59 = arith.cmpf oeq, %31, %37 : vector<8x128xf32>
        %cst_24 = arith.constant 0.000000e+00 : f32
        %60 = vector.broadcast %cst_24 : f32 to vector<8x128xf32>
        %61 = arith.select %59, %46, %60 : vector<8x128xi1>, vector<8x128xf32>
        %62 = arith.subf %46, %61 : vector<8x128xf32>
        %c0_25 = arith.constant 0 : index
        %c2_26 = arith.constant 2 : index
        %63 = arith.index_cast %22 : i32 to index
        %c0_27 = arith.constant 0 : index
        %64 = vector.load %arg4[%c0_25, %c2_26, %63, %c0_27] : memref<1x4x40x128xf32, #tpu.memory_space<vmem>>, vector<1x1x8x128xf32>
        %65 = vector.shape_cast %64 : vector<1x1x8x128xf32> to vector<8x128xf32>
        %66 = arith.addf %61, %65 : vector<8x128xf32>
        %67 = arith.mulf %61, %65 : vector<8x128xf32>
        %68 = arith.subf %66, %67 : vector<8x128xf32>
        %69 = arith.mulf %31, %65 : vector<8x128xf32>
        %70 = arith.addf %arg8, %69 : vector<8x128xf32>
        %71 = arith.addf %arg11, %65 : vector<8x128xf32>
        %72 = arith.addf %31, %65 : vector<8x128xf32>
        %73 = arith.mulf %72, %68 : vector<8x128xf32>
        %74 = arith.addf %arg14, %73 : vector<8x128xf32>
        %75 = arith.cmpf oeq, %34, %37 : vector<8x128xf32>
        %cst_28 = arith.constant 0.000000e+00 : f32
        %76 = vector.broadcast %cst_28 : f32 to vector<8x128xf32>
        %77 = arith.select %75, %62, %76 : vector<8x128xi1>, vector<8x128xf32>
        %c0_29 = arith.constant 0 : index
        %c3_30 = arith.constant 3 : index
        %78 = arith.index_cast %22 : i32 to index
        %c0_31 = arith.constant 0 : index
        %79 = vector.load %arg4[%c0_29, %c3_30, %78, %c0_31] : memref<1x4x40x128xf32, #tpu.memory_space<vmem>>, vector<1x1x8x128xf32>
        %80 = vector.shape_cast %79 : vector<1x1x8x128xf32> to vector<8x128xf32>
        %81 = arith.addf %77, %80 : vector<8x128xf32>
        %82 = arith.mulf %77, %80 : vector<8x128xf32>
        %83 = arith.subf %81, %82 : vector<8x128xf32>
        %84 = arith.mulf %34, %80 : vector<8x128xf32>
        %85 = arith.addf %arg9, %84 : vector<8x128xf32>
        %86 = arith.addf %arg12, %80 : vector<8x128xf32>
        %87 = arith.addf %34, %80 : vector<8x128xf32>
        %88 = arith.mulf %87, %83 : vector<8x128xf32>
        %89 = arith.addf %arg15, %88 : vector<8x128xf32>
        scf.yield %54, %70, %85, %55, %71, %86, %58, %74, %89 : vector<8x128xf32>, vector<8x128xf32>, vector<8x128xf32>, vector<8x128xf32>, vector<8x128xf32>, vector<8x128xf32>, vector<8x128xf32>, vector<8x128xf32>, vector<8x128xf32>
      }
      %c5_i32_5 = arith.constant 5 : i32
      %c0_i32_6 = arith.constant 0 : i32
      %15 = arith.cmpi eq, %arg2, %c0_i32_6 : i32
      %16 = arith.extui %15 : i1 to i32
      %c0_i32_7 = arith.constant 0 : i32
      %17 = arith.cmpi ne, %16, %c0_i32_7 : i32
      scf.if %17 {
        %c0 = arith.constant 0 : index
        %c0_10 = arith.constant 0 : index
        %c0_11 = arith.constant 0 : index
        %c0_12 = arith.constant 0 : index
        %c0_13 = arith.constant 0 : index
        %c0_14 = arith.constant 0 : index
        %21 = vector.load %arg5[%c0, %c0_10, %c0_11, %c0_12, %c0_13, %c0_14] : memref<1x1x3x3x8x128xf32, #tpu.memory_space<vmem>>, vector<1x1x1x1x8x128xf32>
        %22 = vector.shape_cast %21 : vector<1x1x1x1x8x128xf32> to vector<8x128xf32>
        %23 = vector.shape_cast %14#0 : vector<8x128xf32> to vector<1x1x1x1x8x128xf32>
        tpu.vector_store %arg5[%c0, %c0_10, %c0_11, %c0_12, %c0_13, %c0_14], %23 {strides = array<i32>} : memref<1x1x3x3x8x128xf32, #tpu.memory_space<vmem>>, vector<1x1x1x1x8x128xf32>,
        %c0_15 = arith.constant 0 : index
        %c0_16 = arith.constant 0 : index
        %c1 = arith.constant 1 : index
        %c0_17 = arith.constant 0 : index
        %c0_18 = arith.constant 0 : index
        %c0_19 = arith.constant 0 : index
        %24 = vector.load %arg5[%c0_15, %c0_16, %c1, %c0_17, %c0_18, %c0_19] : memref<1x1x3x3x8x128xf32, #tpu.memory_space<vmem>>, vector<1x1x1x1x8x128xf32>
        %25 = vector.shape_cast %24 : vector<1x1x1x1x8x128xf32> to vector<8x128xf32>
        %26 = vector.shape_cast %14#3 : vector<8x128xf32> to vector<1x1x1x1x8x128xf32>
        tpu.vector_store %arg5[%c0_15, %c0_16, %c1, %c0_17, %c0_18, %c0_19], %26 {strides = array<i32>} : memref<1x1x3x3x8x128xf32, #tpu.memory_space<vmem>>, vector<1x1x1x1x8x128xf32>,
        %c0_20 = arith.constant 0 : index
        %c0_21 = arith.constant 0 : index
        %c2 = arith.constant 2 : index
        %c0_22 = arith.constant 0 : index
        %c0_23 = arith.constant 0 : index
        %c0_24 = arith.constant 0 : index
        %27 = vector.load %arg5[%c0_20, %c0_21, %c2, %c0_22, %c0_23, %c0_24] : memref<1x1x3x3x8x128xf32, #tpu.memory_space<vmem>>, vector<1x1x1x1x8x128xf32>
        %28 = vector.shape_cast %27 : vector<1x1x1x1x8x128xf32> to vector<8x128xf32>
        %29 = vector.shape_cast %14#6 : vector<8x128xf32> to vector<1x1x1x1x8x128xf32>
        tpu.vector_store %arg5[%c0_20, %c0_21, %c2, %c0_22, %c0_23, %c0_24], %29 {strides = array<i32>} : memref<1x1x3x3x8x128xf32, #tpu.memory_space<vmem>>, vector<1x1x1x1x8x128xf32>,
        %c0_25 = arith.constant 0 : index
        %c0_26 = arith.constant 0 : index
        %c0_27 = arith.constant 0 : index
        %c1_28 = arith.constant 1 : index
        %c0_29 = arith.constant 0 : index
        %c0_30 = arith.constant 0 : index
        %30 = vector.load %arg5[%c0_25, %c0_26, %c0_27, %c1_28, %c0_29, %c0_30] : memref<1x1x3x3x8x128xf32, #tpu.memory_space<vmem>>, vector<1x1x1x1x8x128xf32>
        %31 = vector.shape_cast %30 : vector<1x1x1x1x8x128xf32> to vector<8x128xf32>
        %32 = vector.shape_cast %14#1 : vector<8x128xf32> to vector<1x1x1x1x8x128xf32>
        tpu.vector_store %arg5[%c0_25, %c0_26, %c0_27, %c1_28, %c0_29, %c0_30], %32 {strides = array<i32>} : memref<1x1x3x3x8x128xf32, #tpu.memory_space<vmem>>, vector<1x1x1x1x8x128xf32>,
        %c0_31 = arith.constant 0 : index
        %c0_32 = arith.constant 0 : index
        %c1_33 = arith.constant 1 : index
        %c1_34 = arith.constant 1 : index
        %c0_35 = arith.constant 0 : index
        %c0_36 = arith.constant 0 : index
        %33 = vector.load %arg5[%c0_31, %c0_32, %c1_33, %c1_34, %c0_35, %c0_36] : memref<1x1x3x3x8x128xf32, #tpu.memory_space<vmem>>, vector<1x1x1x1x8x128xf32>
        %34 = vector.shape_cast %33 : vector<1x1x1x1x8x128xf32> to vector<8x128xf32>
        %35 = vector.shape_cast %14#4 : vector<8x128xf32> to vector<1x1x1x1x8x128xf32>
        tpu.vector_store %arg5[%c0_31, %c0_32, %c1_33, %c1_34, %c0_35, %c0_36], %35 {strides = array<i32>} : memref<1x1x3x3x8x128xf32, #tpu.memory_space<vmem>>, vector<1x1x1x1x8x128xf32>,
        %c0_37 = arith.constant 0 : index
        %c0_38 = arith.constant 0 : index
        %c2_39 = arith.constant 2 : index
        %c1_40 = arith.constant 1 : index
        %c0_41 = arith.constant 0 : index
        %c0_42 = arith.constant 0 : index
        %36 = vector.load %arg5[%c0_37, %c0_38, %c2_39, %c1_40, %c0_41, %c0_42] : memref<1x1x3x3x8x128xf32, #tpu.memory_space<vmem>>, vector<1x1x1x1x8x128xf32>
        %37 = vector.shape_cast %36 : vector<1x1x1x1x8x128xf32> to vector<8x128xf32>
        %38 = vector.shape_cast %14#7 : vector<8x128xf32> to vector<1x1x1x1x8x128xf32>
        tpu.vector_store %arg5[%c0_37, %c0_38, %c2_39, %c1_40, %c0_41, %c0_42], %38 {strides = array<i32>} : memref<1x1x3x3x8x128xf32, #tpu.memory_space<vmem>>, vector<1x1x1x1x8x128xf32>,
        %c0_43 = arith.constant 0 : index
        %c0_44 = arith.constant 0 : index
        %c0_45 = arith.constant 0 : index
        %c2_46 = arith.constant 2 : index
        %c0_47 = arith.constant 0 : index
        %c0_48 = arith.constant 0 : index
        %39 = vector.load %arg5[%c0_43, %c0_44, %c0_45, %c2_46, %c0_47, %c0_48] : memref<1x1x3x3x8x128xf32, #tpu.memory_space<vmem>>, vector<1x1x1x1x8x128xf32>
        %40 = vector.shape_cast %39 : vector<1x1x1x1x8x128xf32> to vector<8x128xf32>
        %41 = vector.shape_cast %14#2 : vector<8x128xf32> to vector<1x1x1x1x8x128xf32>
        tpu.vector_store %arg5[%c0_43, %c0_44, %c0_45, %c2_46, %c0_47, %c0_48], %41 {strides = array<i32>} : memref<1x1x3x3x8x128xf32, #tpu.memory_space<vmem>>, vector<1x1x1x1x8x128xf32>,
        %c0_49 = arith.constant 0 : index
        %c0_50 = arith.constant 0 : index
        %c1_51 = arith.constant 1 : index
        %c2_52 = arith.constant 2 : index
        %c0_53 = arith.constant 0 : index
        %c0_54 = arith.constant 0 : index
        %42 = vector.load %arg5[%c0_49, %c0_50, %c1_51, %c2_52, %c0_53, %c0_54] : memref<1x1x3x3x8x128xf32, #tpu.memory_space<vmem>>, vector<1x1x1x1x8x128xf32>
        %43 = vector.shape_cast %42 : vector<1x1x1x1x8x128xf32> to vector<8x128xf32>
        %44 = vector.shape_cast %14#5 : vector<8x128xf32> to vector<1x1x1x1x8x128xf32>
        tpu.vector_store %arg5[%c0_49, %c0_50, %c1_51, %c2_52, %c0_53, %c0_54], %44 {strides = array<i32>} : memref<1x1x3x3x8x128xf32, #tpu.memory_space<vmem>>, vector<1x1x1x1x8x128xf32>,
        %c0_55 = arith.constant 0 : index
        %c0_56 = arith.constant 0 : index
        %c2_57 = arith.constant 2 : index
        %c2_58 = arith.constant 2 : index
        %c0_59 = arith.constant 0 : index
        %c0_60 = arith.constant 0 : index
        %45 = vector.load %arg5[%c0_55, %c0_56, %c2_57, %c2_58, %c0_59, %c0_60] : memref<1x1x3x3x8x128xf32, #tpu.memory_space<vmem>>, vector<1x1x1x1x8x128xf32>
        %46 = vector.shape_cast %45 : vector<1x1x1x1x8x128xf32> to vector<8x128xf32>
        %47 = vector.shape_cast %14#8 : vector<8x128xf32> to vector<1x1x1x1x8x128xf32>
        tpu.vector_store %arg5[%c0_55, %c0_56, %c2_57, %c2_58, %c0_59, %c0_60], %47 {strides = array<i32>} : memref<1x1x3x3x8x128xf32, #tpu.memory_space<vmem>>, vector<1x1x1x1x8x128xf32>,
      } else {
      }
      %c0_i32_8 = arith.constant 0 : i32
      %18 = arith.cmpi ne, %arg2, %c0_i32_8 : i32
      %19 = arith.extui %18 : i1 to i32
      %c0_i32_9 = arith.constant 0 : i32
      %20 = arith.cmpi ne, %19, %c0_i32_9 : i32
      scf.if %20 {
        %c0 = arith.constant 0 : index
        %c0_10 = arith.constant 0 : index
        %c0_11 = arith.constant 0 : index
        %c0_12 = arith.constant 0 : index
        %c0_13 = arith.constant 0 : index
        %c0_14 = arith.constant 0 : index
        %21 = vector.load %arg5[%c0, %c0_10, %c0_11, %c0_12, %c0_13, %c0_14] : memref<1x1x3x3x8x128xf32, #tpu.memory_space<vmem>>, vector<1x1x1x1x8x128xf32>
        %22 = vector.shape_cast %21 : vector<1x1x1x1x8x128xf32> to vector<8x128xf32>
        %23 = arith.addf %22, %14#0 : vector<8x128xf32>
        %c0_15 = arith.constant 0 : index
        %c0_16 = arith.constant 0 : index
        %c0_17 = arith.constant 0 : index
        %c0_18 = arith.constant 0 : index
        %c0_19 = arith.constant 0 : index
        %c0_20 = arith.constant 0 : index
        %24 = vector.load %arg5[%c0_15, %c0_16, %c0_17, %c0_18, %c0_19, %c0_20] : memref<1x1x3x3x8x128xf32, #tpu.memory_space<vmem>>, vector<1x1x1x1x8x128xf32>
        %25 = vector.shape_cast %24 : vector<1x1x1x1x8x128xf32> to vector<8x128xf32>
        %26 = vector.shape_cast %23 : vector<8x128xf32> to vector<1x1x1x1x8x128xf32>
        tpu.vector_store %arg5[%c0_15, %c0_16, %c0_17, %c0_18, %c0_19, %c0_20], %26 {strides = array<i32>} : memref<1x1x3x3x8x128xf32, #tpu.memory_space<vmem>>, vector<1x1x1x1x8x128xf32>,
        %c0_21 = arith.constant 0 : index
        %c0_22 = arith.constant 0 : index
        %c1 = arith.constant 1 : index
        %c0_23 = arith.constant 0 : index
        %c0_24 = arith.constant 0 : index
        %c0_25 = arith.constant 0 : index
        %27 = vector.load %arg5[%c0_21, %c0_22, %c1, %c0_23, %c0_24, %c0_25] : memref<1x1x3x3x8x128xf32, #tpu.memory_space<vmem>>, vector<1x1x1x1x8x128xf32>
        %28 = vector.shape_cast %27 : vector<1x1x1x1x8x128xf32> to vector<8x128xf32>
        %29 = arith.addf %28, %14#3 : vector<8x128xf32>
        %c0_26 = arith.constant 0 : index
        %c0_27 = arith.constant 0 : index
        %c1_28 = arith.constant 1 : index
        %c0_29 = arith.constant 0 : index
        %c0_30 = arith.constant 0 : index
        %c0_31 = arith.constant 0 : index
        %30 = vector.load %arg5[%c0_26, %c0_27, %c1_28, %c0_29, %c0_30, %c0_31] : memref<1x1x3x3x8x128xf32, #tpu.memory_space<vmem>>, vector<1x1x1x1x8x128xf32>
        %31 = vector.shape_cast %30 : vector<1x1x1x1x8x128xf32> to vector<8x128xf32>
        %32 = vector.shape_cast %29 : vector<8x128xf32> to vector<1x1x1x1x8x128xf32>
        tpu.vector_store %arg5[%c0_26, %c0_27, %c1_28, %c0_29, %c0_30, %c0_31], %32 {strides = array<i32>} : memref<1x1x3x3x8x128xf32, #tpu.memory_space<vmem>>, vector<1x1x1x1x8x128xf32>,
        %c0_32 = arith.constant 0 : index
        %c0_33 = arith.constant 0 : index
        %c2 = arith.constant 2 : index
        %c0_34 = arith.constant 0 : index
        %c0_35 = arith.constant 0 : index
        %c0_36 = arith.constant 0 : index
        %33 = vector.load %arg5[%c0_32, %c0_33, %c2, %c0_34, %c0_35, %c0_36] : memref<1x1x3x3x8x128xf32, #tpu.memory_space<vmem>>, vector<1x1x1x1x8x128xf32>
        %34 = vector.shape_cast %33 : vector<1x1x1x1x8x128xf32> to vector<8x128xf32>
        %35 = arith.addf %34, %14#6 : vector<8x128xf32>
        %c0_37 = arith.constant 0 : index
        %c0_38 = arith.constant 0 : index
        %c2_39 = arith.constant 2 : index
        %c0_40 = arith.constant 0 : index
        %c0_41 = arith.constant 0 : index
        %c0_42 = arith.constant 0 : index
        %36 = vector.load %arg5[%c0_37, %c0_38, %c2_39, %c0_40, %c0_41, %c0_42] : memref<1x1x3x3x8x128xf32, #tpu.memory_space<vmem>>, vector<1x1x1x1x8x128xf32>
        %37 = vector.shape_cast %36 : vector<1x1x1x1x8x128xf32> to vector<8x128xf32>
        %38 = vector.shape_cast %35 : vector<8x128xf32> to vector<1x1x1x1x8x128xf32>
        tpu.vector_store %arg5[%c0_37, %c0_38, %c2_39, %c0_40, %c0_41, %c0_42], %38 {strides = array<i32>} : memref<1x1x3x3x8x128xf32, #tpu.memory_space<vmem>>, vector<1x1x1x1x8x128xf32>,
        %c0_43 = arith.constant 0 : index
        %c0_44 = arith.constant 0 : index
        %c0_45 = arith.constant 0 : index
        %c1_46 = arith.constant 1 : index
        %c0_47 = arith.constant 0 : index
        %c0_48 = arith.constant 0 : index
        %39 = vector.load %arg5[%c0_43, %c0_44, %c0_45, %c1_46, %c0_47, %c0_48] : memref<1x1x3x3x8x128xf32, #tpu.memory_space<vmem>>, vector<1x1x1x1x8x128xf32>
        %40 = vector.shape_cast %39 : vector<1x1x1x1x8x128xf32> to vector<8x128xf32>
        %41 = arith.addf %40, %14#1 : vector<8x128xf32>
        %c0_49 = arith.constant 0 : index
        %c0_50 = arith.constant 0 : index
        %c0_51 = arith.constant 0 : index
        %c1_52 = arith.constant 1 : index
        %c0_53 = arith.constant 0 : index
        %c0_54 = arith.constant 0 : index
        %42 = vector.load %arg5[%c0_49, %c0_50, %c0_51, %c1_52, %c0_53, %c0_54] : memref<1x1x3x3x8x128xf32, #tpu.memory_space<vmem>>, vector<1x1x1x1x8x128xf32>
        %43 = vector.shape_cast %42 : vector<1x1x1x1x8x128xf32> to vector<8x128xf32>
        %44 = vector.shape_cast %41 : vector<8x128xf32> to vector<1x1x1x1x8x128xf32>
        tpu.vector_store %arg5[%c0_49, %c0_50, %c0_51, %c1_52, %c0_53, %c0_54], %44 {strides = array<i32>} : memref<1x1x3x3x8x128xf32, #tpu.memory_space<vmem>>, vector<1x1x1x1x8x128xf32>,
        %c0_55 = arith.constant 0 : index
        %c0_56 = arith.constant 0 : index
        %c1_57 = arith.constant 1 : index
        %c1_58 = arith.constant 1 : index
        %c0_59 = arith.constant 0 : index
        %c0_60 = arith.constant 0 : index
        %45 = vector.load %arg5[%c0_55, %c0_56, %c1_57, %c1_58, %c0_59, %c0_60] : memref<1x1x3x3x8x128xf32, #tpu.memory_space<vmem>>, vector<1x1x1x1x8x128xf32>
        %46 = vector.shape_cast %45 : vector<1x1x1x1x8x128xf32> to vector<8x128xf32>
        %47 = arith.addf %46, %14#4 : vector<8x128xf32>
        %c0_61 = arith.constant 0 : index
        %c0_62 = arith.constant 0 : index
        %c1_63 = arith.constant 1 : index
        %c1_64 = arith.constant 1 : index
        %c0_65 = arith.constant 0 : index
        %c0_66 = arith.constant 0 : index
        %48 = vector.load %arg5[%c0_61, %c0_62, %c1_63, %c1_64, %c0_65, %c0_66] : memref<1x1x3x3x8x128xf32, #tpu.memory_space<vmem>>, vector<1x1x1x1x8x128xf32>
        %49 = vector.shape_cast %48 : vector<1x1x1x1x8x128xf32> to vector<8x128xf32>
        %50 = vector.shape_cast %47 : vector<8x128xf32> to vector<1x1x1x1x8x128xf32>
        tpu.vector_store %arg5[%c0_61, %c0_62, %c1_63, %c1_64, %c0_65, %c0_66], %50 {strides = array<i32>} : memref<1x1x3x3x8x128xf32, #tpu.memory_space<vmem>>, vector<1x1x1x1x8x128xf32>,
        %c0_67 = arith.constant 0 : index
        %c0_68 = arith.constant 0 : index
        %c2_69 = arith.constant 2 : index
        %c1_70 = arith.constant 1 : index
        %c0_71 = arith.constant 0 : index
        %c0_72 = arith.constant 0 : index
        %51 = vector.load %arg5[%c0_67, %c0_68, %c2_69, %c1_70, %c0_71, %c0_72] : memref<1x1x3x3x8x128xf32, #tpu.memory_space<vmem>>, vector<1x1x1x1x8x128xf32>
        %52 = vector.shape_cast %51 : vector<1x1x1x1x8x128xf32> to vector<8x128xf32>
        %53 = arith.addf %52, %14#7 : vector<8x128xf32>
        %c0_73 = arith.constant 0 : index
        %c0_74 = arith.constant 0 : index
        %c2_75 = arith.constant 2 : index
        %c1_76 = arith.constant 1 : index
        %c0_77 = arith.constant 0 : index
        %c0_78 = arith.constant 0 : index
        %54 = vector.load %arg5[%c0_73, %c0_74, %c2_75, %c1_76, %c0_77, %c0_78] : memref<1x1x3x3x8x128xf32, #tpu.memory_space<vmem>>, vector<1x1x1x1x8x128xf32>
        %55 = vector.shape_cast %54 : vector<1x1x1x1x8x128xf32> to vector<8x128xf32>
        %56 = vector.shape_cast %53 : vector<8x128xf32> to vector<1x1x1x1x8x128xf32>
        tpu.vector_store %arg5[%c0_73, %c0_74, %c2_75, %c1_76, %c0_77, %c0_78], %56 {strides = array<i32>} : memref<1x1x3x3x8x128xf32, #tpu.memory_space<vmem>>, vector<1x1x1x1x8x128xf32>,
        %c0_79 = arith.constant 0 : index
        %c0_80 = arith.constant 0 : index
        %c0_81 = arith.constant 0 : index
        %c2_82 = arith.constant 2 : index
        %c0_83 = arith.constant 0 : index
        %c0_84 = arith.constant 0 : index
        %57 = vector.load %arg5[%c0_79, %c0_80, %c0_81, %c2_82, %c0_83, %c0_84] : memref<1x1x3x3x8x128xf32, #tpu.memory_space<vmem>>, vector<1x1x1x1x8x128xf32>
        %58 = vector.shape_cast %57 : vector<1x1x1x1x8x128xf32> to vector<8x128xf32>
        %59 = arith.addf %58, %14#2 : vector<8x128xf32>
        %c0_85 = arith.constant 0 : index
        %c0_86 = arith.constant 0 : index
        %c0_87 = arith.constant 0 : index
        %c2_88 = arith.constant 2 : index
        %c0_89 = arith.constant 0 : index
        %c0_90 = arith.constant 0 : index
        %60 = vector.load %arg5[%c0_85, %c0_86, %c0_87, %c2_88, %c0_89, %c0_90] : memref<1x1x3x3x8x128xf32, #tpu.memory_space<vmem>>, vector<1x1x1x1x8x128xf32>
        %61 = vector.shape_cast %60 : vector<1x1x1x1x8x128xf32> to vector<8x128xf32>
        %62 = vector.shape_cast %59 : vector<8x128xf32> to vector<1x1x1x1x8x128xf32>
        tpu.vector_store %arg5[%c0_85, %c0_86, %c0_87, %c2_88, %c0_89, %c0_90], %62 {strides = array<i32>} : memref<1x1x3x3x8x128xf32, #tpu.memory_space<vmem>>, vector<1x1x1x1x8x128xf32>,
        %c0_91 = arith.constant 0 : index
        %c0_92 = arith.constant 0 : index
        %c1_93 = arith.constant 1 : index
        %c2_94 = arith.constant 2 : index
        %c0_95 = arith.constant 0 : index
        %c0_96 = arith.constant 0 : index
        %63 = vector.load %arg5[%c0_91, %c0_92, %c1_93, %c2_94, %c0_95, %c0_96] : memref<1x1x3x3x8x128xf32, #tpu.memory_space<vmem>>, vector<1x1x1x1x8x128xf32>
        %64 = vector.shape_cast %63 : vector<1x1x1x1x8x128xf32> to vector<8x128xf32>
        %65 = arith.addf %64, %14#5 : vector<8x128xf32>
        %c0_97 = arith.constant 0 : index
        %c0_98 = arith.constant 0 : index
        %c1_99 = arith.constant 1 : index
        %c2_100 = arith.constant 2 : index
        %c0_101 = arith.constant 0 : index
        %c0_102 = arith.constant 0 : index
        %66 = vector.load %arg5[%c0_97, %c0_98, %c1_99, %c2_100, %c0_101, %c0_102] : memref<1x1x3x3x8x128xf32, #tpu.memory_space<vmem>>, vector<1x1x1x1x8x128xf32>
        %67 = vector.shape_cast %66 : vector<1x1x1x1x8x128xf32> to vector<8x128xf32>
        %68 = vector.shape_cast %65 : vector<8x128xf32> to vector<1x1x1x1x8x128xf32>
        tpu.vector_store %arg5[%c0_97, %c0_98, %c1_99, %c2_100, %c0_101, %c0_102], %68 {strides = array<i32>} : memref<1x1x3x3x8x128xf32, #tpu.memory_space<vmem>>, vector<1x1x1x1x8x128xf32>,
        %c0_103 = arith.constant 0 : index
        %c0_104 = arith.constant 0 : index
        %c2_105 = arith.constant 2 : index
        %c2_106 = arith.constant 2 : index
        %c0_107 = arith.constant 0 : index
        %c0_108 = arith.constant 0 : index
        %69 = vector.load %arg5[%c0_103, %c0_104, %c2_105, %c2_106, %c0_107, %c0_108] : memref<1x1x3x3x8x128xf32, #tpu.memory_space<vmem>>, vector<1x1x1x1x8x128xf32>
        %70 = vector.shape_cast %69 : vector<1x1x1x1x8x128xf32> to vector<8x128xf32>
        %71 = arith.addf %70, %14#8 : vector<8x128xf32>
        %c0_109 = arith.constant 0 : index
        %c0_110 = arith.constant 0 : index
        %c2_111 = arith.constant 2 : index
        %c2_112 = arith.constant 2 : index
        %c0_113 = arith.constant 0 : index
        %c0_114 = arith.constant 0 : index
        %72 = vector.load %arg5[%c0_109, %c0_110, %c2_111, %c2_112, %c0_113, %c0_114] : memref<1x1x3x3x8x128xf32, #tpu.memory_space<vmem>>, vector<1x1x1x1x8x128xf32>
        %73 = vector.shape_cast %72 : vector<1x1x1x1x8x128xf32> to vector<8x128xf32>
        %74 = vector.shape_cast %71 : vector<8x128xf32> to vector<1x1x1x1x8x128xf32>
        tpu.vector_store %arg5[%c0_109, %c0_110, %c2_111, %c2_112, %c0_113, %c0_114], %74 {strides = array<i32>} : memref<1x1x3x3x8x128xf32, #tpu.memory_space<vmem>>, vector<1x1x1x1x8x128xf32>,
      } else {
      }
    } else {
    }
    %true = arith.constant true
    %8 = arith.xori %4, %true : i1
    %9 = arith.andi %5, %8 : i1
    %10 = arith.extui %9 : i1 to i32
    %c0_i32_2 = arith.constant 0 : i32
    %11 = arith.cmpi ne, %10, %c0_i32_2 : i32
    scf.if %11 {
      %c1_i32_3 = arith.constant 1 : i32
      %12 = arith.muli %arg1, %c1_i32_3 : i32
      %13 = arith.addi %12, %arg2 : i32
      %c40_i32_4 = arith.constant 40 : i32
      %14 = arith.muli %13, %c40_i32_4 : i32
      %15 = tpu.iota {dimensions = array<i32: 0>} : vector<8x128xi32>
      %cst = arith.constant 0.000000e+00 : f32
      %16 = vector.broadcast %cst : f32 to vector<8x128xf32>
      %c0_i32_5 = arith.constant 0 : i32
      %c5_i32 = arith.constant 5 : i32
      %17 = arith.addi %c0_i32_5, %c5_i32 : i32
      %c1_i32_6 = arith.constant 1 : i32
      %18:9 = scf.for %arg6 = %c0_i32_5 to %17 step %c1_i32_6 iter_args(%arg7 = %16, %arg8 = %16, %arg9 = %16, %arg10 = %16, %arg11 = %16, %arg12 = %16, %arg13 = %16, %arg14 = %16, %arg15 = %16) -> (vector<8x128xf32>, vector<8x128xf32>, vector<8x128xf32>, vector<8x128xf32>, vector<8x128xf32>, vector<8x128xf32>, vector<8x128xf32>, vector<8x128xf32>, vector<8x128xf32>)  : i32 {
        %c8_i32 = arith.constant 8 : i32
        %25 = arith.muli %arg6, %c8_i32 : i32
        %26 = tpu.assume_multiple %25, 8 : i32
        %c8_i32_12 = arith.constant 8 : i32
        %27 = arith.muli %arg6, %c8_i32_12 : i32
        %28 = arith.addi %14, %27 : i32
        %29 = vector.broadcast %28 : i32 to vector<8x128xi32>
        %30 = arith.addi %29, %15 : vector<8x128xi32>
        %c65_i32_13 = arith.constant 65 : i32
        %31 = vector.broadcast %c65_i32_13 : i32 to vector<8x128xi32>
        %32 = arith.cmpi slt, %30, %31 : vector<8x128xi32>
        %c0 = arith.constant 0 : index
        %c0_14 = arith.constant 0 : index
        %33 = arith.index_cast %26 : i32 to index
        %c0_15 = arith.constant 0 : index
        %34 = vector.load %arg3[%c0, %c0_14, %33, %c0_15] : memref<1x4x40x128xf32, #tpu.memory_space<vmem>>, vector<1x1x8x128xf32>
        %35 = vector.shape_cast %34 : vector<1x1x8x128xf32> to vector<8x128xf32>
        %cst_16 = arith.constant 0.000000e+00 : f32
        %36 = vector.broadcast %cst_16 : f32 to vector<8x128xf32>
        %37 = arith.select %32, %35, %36 : vector<8x128xi1>, vector<8x128xf32>
        %c0_17 = arith.constant 0 : index
        %c1 = arith.constant 1 : index
        %38 = arith.index_cast %26 : i32 to index
        %c0_18 = arith.constant 0 : index
        %39 = vector.load %arg3[%c0_17, %c1, %38, %c0_18] : memref<1x4x40x128xf32, #tpu.memory_space<vmem>>, vector<1x1x8x128xf32>
        %40 = vector.shape_cast %39 : vector<1x1x8x128xf32> to vector<8x128xf32>
        %cst_19 = arith.constant 0.000000e+00 : f32
        %41 = vector.broadcast %cst_19 : f32 to vector<8x128xf32>
        %42 = arith.select %32, %40, %41 : vector<8x128xi1>, vector<8x128xf32>
        %c0_20 = arith.constant 0 : index
        %c2 = arith.constant 2 : index
        %43 = arith.index_cast %26 : i32 to index
        %c0_21 = arith.constant 0 : index
        %44 = vector.load %arg3[%c0_20, %c2, %43, %c0_21] : memref<1x4x40x128xf32, #tpu.memory_space<vmem>>, vector<1x1x8x128xf32>
        %45 = vector.shape_cast %44 : vector<1x1x8x128xf32> to vector<8x128xf32>
        %cst_22 = arith.constant 0.000000e+00 : f32
        %46 = vector.broadcast %cst_22 : f32 to vector<8x128xf32>
        %47 = arith.select %32, %45, %46 : vector<8x128xi1>, vector<8x128xf32>
        %c0_23 = arith.constant 0 : index
        %c3 = arith.constant 3 : index
        %48 = arith.index_cast %26 : i32 to index
        %c0_24 = arith.constant 0 : index
        %49 = vector.load %arg3[%c0_23, %c3, %48, %c0_24] : memref<1x4x40x128xf32, #tpu.memory_space<vmem>>, vector<1x1x8x128xf32>
        %50 = vector.shape_cast %49 : vector<1x1x8x128xf32> to vector<8x128xf32>
        %cst_25 = arith.constant 0.000000e+00 : f32
        %51 = vector.broadcast %cst_25 : f32 to vector<8x128xf32>
        %52 = arith.select %32, %50, %51 : vector<8x128xi1>, vector<8x128xf32>
        %53 = arith.maximumf %37, %42 : vector<8x128xf32>
        %54 = arith.maximumf %53, %47 : vector<8x128xf32>
        %55 = arith.maximumf %54, %52 : vector<8x128xf32>
        %cst_26 = arith.constant 1.000000e+00 : f32
        %56 = vector.broadcast %cst_26 : f32 to vector<8x128xf32>
        %57 = arith.cmpf oeq, %37, %55 : vector<8x128xf32>
        %cst_27 = arith.constant 0.000000e+00 : f32
        %58 = vector.broadcast %cst_27 : f32 to vector<8x128xf32>
        %59 = arith.select %57, %56, %58 : vector<8x128xi1>, vector<8x128xf32>
        %60 = arith.subf %56, %59 : vector<8x128xf32>
        %61 = arith.cmpf oeq, %42, %55 : vector<8x128xf32>
        %cst_28 = arith.constant 0.000000e+00 : f32
        %62 = vector.broadcast %cst_28 : f32 to vector<8x128xf32>
        %63 = arith.select %61, %60, %62 : vector<8x128xi1>, vector<8x128xf32>
        %64 = arith.subf %60, %63 : vector<8x128xf32>
        %c0_29 = arith.constant 0 : index
        %c1_30 = arith.constant 1 : index
        %65 = arith.index_cast %26 : i32 to index
        %c0_31 = arith.constant 0 : index
        %66 = vector.load %arg4[%c0_29, %c1_30, %65, %c0_31] : memref<1x4x40x128xf32, #tpu.memory_space<vmem>>, vector<1x1x8x128xf32>
        %67 = vector.shape_cast %66 : vector<1x1x8x128xf32> to vector<8x128xf32>
        %cst_32 = arith.constant 0.000000e+00 : f32
        %68 = vector.broadcast %cst_32 : f32 to vector<8x128xf32>
        %69 = arith.select %32, %67, %68 : vector<8x128xi1>, vector<8x128xf32>
        %70 = arith.addf %63, %69 : vector<8x128xf32>
        %71 = arith.mulf %63, %69 : vector<8x128xf32>
        %72 = arith.subf %70, %71 : vector<8x128xf32>
        %73 = arith.mulf %42, %69 : vector<8x128xf32>
        %74 = arith.addf %arg7, %73 : vector<8x128xf32>
        %75 = arith.addf %arg10, %69 : vector<8x128xf32>
        %76 = arith.addf %42, %69 : vector<8x128xf32>
        %77 = arith.mulf %76, %72 : vector<8x128xf32>
        %78 = arith.addf %arg13, %77 : vector<8x128xf32>
        %79 = arith.cmpf oeq, %47, %55 : vector<8x128xf32>
        %cst_33 = arith.constant 0.000000e+00 : f32
        %80 = vector.broadcast %cst_33 : f32 to vector<8x128xf32>
        %81 = arith.select %79, %64, %80 : vector<8x128xi1>, vector<8x128xf32>
        %82 = arith.subf %64, %81 : vector<8x128xf32>
        %c0_34 = arith.constant 0 : index
        %c2_35 = arith.constant 2 : index
        %83 = arith.index_cast %26 : i32 to index
        %c0_36 = arith.constant 0 : index
        %84 = vector.load %arg4[%c0_34, %c2_35, %83, %c0_36] : memref<1x4x40x128xf32, #tpu.memory_space<vmem>>, vector<1x1x8x128xf32>
        %85 = vector.shape_cast %84 : vector<1x1x8x128xf32> to vector<8x128xf32>
        %cst_37 = arith.constant 0.000000e+00 : f32
        %86 = vector.broadcast %cst_37 : f32 to vector<8x128xf32>
        %87 = arith.select %32, %85, %86 : vector<8x128xi1>, vector<8x128xf32>
        %88 = arith.addf %81, %87 : vector<8x128xf32>
        %89 = arith.mulf %81, %87 : vector<8x128xf32>
        %90 = arith.subf %88, %89 : vector<8x128xf32>
        %91 = arith.mulf %47, %87 : vector<8x128xf32>
        %92 = arith.addf %arg8, %91 : vector<8x128xf32>
        %93 = arith.addf %arg11, %87 : vector<8x128xf32>
        %94 = arith.addf %47, %87 : vector<8x128xf32>
        %95 = arith.mulf %94, %90 : vector<8x128xf32>
        %96 = arith.addf %arg14, %95 : vector<8x128xf32>
        %97 = arith.cmpf oeq, %52, %55 : vector<8x128xf32>
        %cst_38 = arith.constant 0.000000e+00 : f32
        %98 = vector.broadcast %cst_38 : f32 to vector<8x128xf32>
        %99 = arith.select %97, %82, %98 : vector<8x128xi1>, vector<8x128xf32>
        %c0_39 = arith.constant 0 : index
        %c3_40 = arith.constant 3 : index
        %100 = arith.index_cast %26 : i32 to index
        %c0_41 = arith.constant 0 : index
        %101 = vector.load %arg4[%c0_39, %c3_40, %100, %c0_41] : memref<1x4x40x128xf32, #tpu.memory_space<vmem>>, vector<1x1x8x128xf32>
        %102 = vector.shape_cast %101 : vector<1x1x8x128xf32> to vector<8x128xf32>
        %cst_42 = arith.constant 0.000000e+00 : f32
        %103 = vector.broadcast %cst_42 : f32 to vector<8x128xf32>
        %104 = arith.select %32, %102, %103 : vector<8x128xi1>, vector<8x128xf32>
        %105 = arith.addf %99, %104 : vector<8x128xf32>
        %106 = arith.mulf %99, %104 : vector<8x128xf32>
        %107 = arith.subf %105, %106 : vector<8x128xf32>
        %108 = arith.mulf %52, %104 : vector<8x128xf32>
        %109 = arith.addf %arg9, %108 : vector<8x128xf32>
        %110 = arith.addf %arg12, %104 : vector<8x128xf32>
        %111 = arith.addf %52, %104 : vector<8x128xf32>
        %112 = arith.mulf %111, %107 : vector<8x128xf32>
        %113 = arith.addf %arg15, %112 : vector<8x128xf32>
        scf.yield %74, %92, %109, %75, %93, %110, %78, %96, %113 : vector<8x128xf32>, vector<8x128xf32>, vector<8x128xf32>, vector<8x128xf32>, vector<8x128xf32>, vector<8x128xf32>, vector<8x128xf32>, vector<8x128xf32>, vector<8x128xf32>
      }
      %c5_i32_7 = arith.constant 5 : i32
      %c0_i32_8 = arith.constant 0 : i32
      %19 = arith.cmpi eq, %arg2, %c0_i32_8 : i32
      %20 = arith.extui %19 : i1 to i32
      %c0_i32_9 = arith.constant 0 : i32
      %21 = arith.cmpi ne, %20, %c0_i32_9 : i32
      scf.if %21 {
        %c0 = arith.constant 0 : index
        %c0_12 = arith.constant 0 : index
        %c0_13 = arith.constant 0 : index
        %c0_14 = arith.constant 0 : index
        %c0_15 = arith.constant 0 : index
        %c0_16 = arith.constant 0 : index
        %25 = vector.load %arg5[%c0, %c0_12, %c0_13, %c0_14, %c0_15, %c0_16] : memref<1x1x3x3x8x128xf32, #tpu.memory_space<vmem>>, vector<1x1x1x1x8x128xf32>
        %26 = vector.shape_cast %25 : vector<1x1x1x1x8x128xf32> to vector<8x128xf32>
        %27 = vector.shape_cast %18#0 : vector<8x128xf32> to vector<1x1x1x1x8x128xf32>
        tpu.vector_store %arg5[%c0, %c0_12, %c0_13, %c0_14, %c0_15, %c0_16], %27 {strides = array<i32>} : memref<1x1x3x3x8x128xf32, #tpu.memory_space<vmem>>, vector<1x1x1x1x8x128xf32>,
        %c0_17 = arith.constant 0 : index
        %c0_18 = arith.constant 0 : index
        %c1 = arith.constant 1 : index
        %c0_19 = arith.constant 0 : index
        %c0_20 = arith.constant 0 : index
        %c0_21 = arith.constant 0 : index
        %28 = vector.load %arg5[%c0_17, %c0_18, %c1, %c0_19, %c0_20, %c0_21] : memref<1x1x3x3x8x128xf32, #tpu.memory_space<vmem>>, vector<1x1x1x1x8x128xf32>
        %29 = vector.shape_cast %28 : vector<1x1x1x1x8x128xf32> to vector<8x128xf32>
        %30 = vector.shape_cast %18#3 : vector<8x128xf32> to vector<1x1x1x1x8x128xf32>
        tpu.vector_store %arg5[%c0_17, %c0_18, %c1, %c0_19, %c0_20, %c0_21], %30 {strides = array<i32>} : memref<1x1x3x3x8x128xf32, #tpu.memory_space<vmem>>, vector<1x1x1x1x8x128xf32>,
        %c0_22 = arith.constant 0 : index
        %c0_23 = arith.constant 0 : index
        %c2 = arith.constant 2 : index
        %c0_24 = arith.constant 0 : index
        %c0_25 = arith.constant 0 : index
        %c0_26 = arith.constant 0 : index
        %31 = vector.load %arg5[%c0_22, %c0_23, %c2, %c0_24, %c0_25, %c0_26] : memref<1x1x3x3x8x128xf32, #tpu.memory_space<vmem>>, vector<1x1x1x1x8x128xf32>
        %32 = vector.shape_cast %31 : vector<1x1x1x1x8x128xf32> to vector<8x128xf32>
        %33 = vector.shape_cast %18#6 : vector<8x128xf32> to vector<1x1x1x1x8x128xf32>
        tpu.vector_store %arg5[%c0_22, %c0_23, %c2, %c0_24, %c0_25, %c0_26], %33 {strides = array<i32>} : memref<1x1x3x3x8x128xf32, #tpu.memory_space<vmem>>, vector<1x1x1x1x8x128xf32>,
        %c0_27 = arith.constant 0 : index
        %c0_28 = arith.constant 0 : index
        %c0_29 = arith.constant 0 : index
        %c1_30 = arith.constant 1 : index
        %c0_31 = arith.constant 0 : index
        %c0_32 = arith.constant 0 : index
        %34 = vector.load %arg5[%c0_27, %c0_28, %c0_29, %c1_30, %c0_31, %c0_32] : memref<1x1x3x3x8x128xf32, #tpu.memory_space<vmem>>, vector<1x1x1x1x8x128xf32>
        %35 = vector.shape_cast %34 : vector<1x1x1x1x8x128xf32> to vector<8x128xf32>
        %36 = vector.shape_cast %18#1 : vector<8x128xf32> to vector<1x1x1x1x8x128xf32>
        tpu.vector_store %arg5[%c0_27, %c0_28, %c0_29, %c1_30, %c0_31, %c0_32], %36 {strides = array<i32>} : memref<1x1x3x3x8x128xf32, #tpu.memory_space<vmem>>, vector<1x1x1x1x8x128xf32>,
        %c0_33 = arith.constant 0 : index
        %c0_34 = arith.constant 0 : index
        %c1_35 = arith.constant 1 : index
        %c1_36 = arith.constant 1 : index
        %c0_37 = arith.constant 0 : index
        %c0_38 = arith.constant 0 : index
        %37 = vector.load %arg5[%c0_33, %c0_34, %c1_35, %c1_36, %c0_37, %c0_38] : memref<1x1x3x3x8x128xf32, #tpu.memory_space<vmem>>, vector<1x1x1x1x8x128xf32>
        %38 = vector.shape_cast %37 : vector<1x1x1x1x8x128xf32> to vector<8x128xf32>
        %39 = vector.shape_cast %18#4 : vector<8x128xf32> to vector<1x1x1x1x8x128xf32>
        tpu.vector_store %arg5[%c0_33, %c0_34, %c1_35, %c1_36, %c0_37, %c0_38], %39 {strides = array<i32>} : memref<1x1x3x3x8x128xf32, #tpu.memory_space<vmem>>, vector<1x1x1x1x8x128xf32>,
        %c0_39 = arith.constant 0 : index
        %c0_40 = arith.constant 0 : index
        %c2_41 = arith.constant 2 : index
        %c1_42 = arith.constant 1 : index
        %c0_43 = arith.constant 0 : index
        %c0_44 = arith.constant 0 : index
        %40 = vector.load %arg5[%c0_39, %c0_40, %c2_41, %c1_42, %c0_43, %c0_44] : memref<1x1x3x3x8x128xf32, #tpu.memory_space<vmem>>, vector<1x1x1x1x8x128xf32>
        %41 = vector.shape_cast %40 : vector<1x1x1x1x8x128xf32> to vector<8x128xf32>
        %42 = vector.shape_cast %18#7 : vector<8x128xf32> to vector<1x1x1x1x8x128xf32>
        tpu.vector_store %arg5[%c0_39, %c0_40, %c2_41, %c1_42, %c0_43, %c0_44], %42 {strides = array<i32>} : memref<1x1x3x3x8x128xf32, #tpu.memory_space<vmem>>, vector<1x1x1x1x8x128xf32>,
        %c0_45 = arith.constant 0 : index
        %c0_46 = arith.constant 0 : index
        %c0_47 = arith.constant 0 : index
        %c2_48 = arith.constant 2 : index
        %c0_49 = arith.constant 0 : index
        %c0_50 = arith.constant 0 : index
        %43 = vector.load %arg5[%c0_45, %c0_46, %c0_47, %c2_48, %c0_49, %c0_50] : memref<1x1x3x3x8x128xf32, #tpu.memory_space<vmem>>, vector<1x1x1x1x8x128xf32>
        %44 = vector.shape_cast %43 : vector<1x1x1x1x8x128xf32> to vector<8x128xf32>
        %45 = vector.shape_cast %18#2 : vector<8x128xf32> to vector<1x1x1x1x8x128xf32>
        tpu.vector_store %arg5[%c0_45, %c0_46, %c0_47, %c2_48, %c0_49, %c0_50], %45 {strides = array<i32>} : memref<1x1x3x3x8x128xf32, #tpu.memory_space<vmem>>, vector<1x1x1x1x8x128xf32>,
        %c0_51 = arith.constant 0 : index
        %c0_52 = arith.constant 0 : index
        %c1_53 = arith.constant 1 : index
        %c2_54 = arith.constant 2 : index
        %c0_55 = arith.constant 0 : index
        %c0_56 = arith.constant 0 : index
        %46 = vector.load %arg5[%c0_51, %c0_52, %c1_53, %c2_54, %c0_55, %c0_56] : memref<1x1x3x3x8x128xf32, #tpu.memory_space<vmem>>, vector<1x1x1x1x8x128xf32>
        %47 = vector.shape_cast %46 : vector<1x1x1x1x8x128xf32> to vector<8x128xf32>
        %48 = vector.shape_cast %18#5 : vector<8x128xf32> to vector<1x1x1x1x8x128xf32>
        tpu.vector_store %arg5[%c0_51, %c0_52, %c1_53, %c2_54, %c0_55, %c0_56], %48 {strides = array<i32>} : memref<1x1x3x3x8x128xf32, #tpu.memory_space<vmem>>, vector<1x1x1x1x8x128xf32>,
        %c0_57 = arith.constant 0 : index
        %c0_58 = arith.constant 0 : index
        %c2_59 = arith.constant 2 : index
        %c2_60 = arith.constant 2 : index
        %c0_61 = arith.constant 0 : index
        %c0_62 = arith.constant 0 : index
        %49 = vector.load %arg5[%c0_57, %c0_58, %c2_59, %c2_60, %c0_61, %c0_62] : memref<1x1x3x3x8x128xf32, #tpu.memory_space<vmem>>, vector<1x1x1x1x8x128xf32>
        %50 = vector.shape_cast %49 : vector<1x1x1x1x8x128xf32> to vector<8x128xf32>
        %51 = vector.shape_cast %18#8 : vector<8x128xf32> to vector<1x1x1x1x8x128xf32>
        tpu.vector_store %arg5[%c0_57, %c0_58, %c2_59, %c2_60, %c0_61, %c0_62], %51 {strides = array<i32>} : memref<1x1x3x3x8x128xf32, #tpu.memory_space<vmem>>, vector<1x1x1x1x8x128xf32>,
      } else {
      }
      %c0_i32_10 = arith.constant 0 : i32
      %22 = arith.cmpi ne, %arg2, %c0_i32_10 : i32
      %23 = arith.extui %22 : i1 to i32
      %c0_i32_11 = arith.constant 0 : i32
      %24 = arith.cmpi ne, %23, %c0_i32_11 : i32
      scf.if %24 {
        %c0 = arith.constant 0 : index
        %c0_12 = arith.constant 0 : index
        %c0_13 = arith.constant 0 : index
        %c0_14 = arith.constant 0 : index
        %c0_15 = arith.constant 0 : index
        %c0_16 = arith.constant 0 : index
        %25 = vector.load %arg5[%c0, %c0_12, %c0_13, %c0_14, %c0_15, %c0_16] : memref<1x1x3x3x8x128xf32, #tpu.memory_space<vmem>>, vector<1x1x1x1x8x128xf32>
        %26 = vector.shape_cast %25 : vector<1x1x1x1x8x128xf32> to vector<8x128xf32>
        %27 = arith.addf %26, %18#0 : vector<8x128xf32>
        %c0_17 = arith.constant 0 : index
        %c0_18 = arith.constant 0 : index
        %c0_19 = arith.constant 0 : index
        %c0_20 = arith.constant 0 : index
        %c0_21 = arith.constant 0 : index
        %c0_22 = arith.constant 0 : index
        %28 = vector.load %arg5[%c0_17, %c0_18, %c0_19, %c0_20, %c0_21, %c0_22] : memref<1x1x3x3x8x128xf32, #tpu.memory_space<vmem>>, vector<1x1x1x1x8x128xf32>
        %29 = vector.shape_cast %28 : vector<1x1x1x1x8x128xf32> to vector<8x128xf32>
        %30 = vector.shape_cast %27 : vector<8x128xf32> to vector<1x1x1x1x8x128xf32>
        tpu.vector_store %arg5[%c0_17, %c0_18, %c0_19, %c0_20, %c0_21, %c0_22], %30 {strides = array<i32>} : memref<1x1x3x3x8x128xf32, #tpu.memory_space<vmem>>, vector<1x1x1x1x8x128xf32>,
        %c0_23 = arith.constant 0 : index
        %c0_24 = arith.constant 0 : index
        %c1 = arith.constant 1 : index
        %c0_25 = arith.constant 0 : index
        %c0_26 = arith.constant 0 : index
        %c0_27 = arith.constant 0 : index
        %31 = vector.load %arg5[%c0_23, %c0_24, %c1, %c0_25, %c0_26, %c0_27] : memref<1x1x3x3x8x128xf32, #tpu.memory_space<vmem>>, vector<1x1x1x1x8x128xf32>
        %32 = vector.shape_cast %31 : vector<1x1x1x1x8x128xf32> to vector<8x128xf32>
        %33 = arith.addf %32, %18#3 : vector<8x128xf32>
        %c0_28 = arith.constant 0 : index
        %c0_29 = arith.constant 0 : index
        %c1_30 = arith.constant 1 : index
        %c0_31 = arith.constant 0 : index
        %c0_32 = arith.constant 0 : index
        %c0_33 = arith.constant 0 : index
        %34 = vector.load %arg5[%c0_28, %c0_29, %c1_30, %c0_31, %c0_32, %c0_33] : memref<1x1x3x3x8x128xf32, #tpu.memory_space<vmem>>, vector<1x1x1x1x8x128xf32>
        %35 = vector.shape_cast %34 : vector<1x1x1x1x8x128xf32> to vector<8x128xf32>
        %36 = vector.shape_cast %33 : vector<8x128xf32> to vector<1x1x1x1x8x128xf32>
        tpu.vector_store %arg5[%c0_28, %c0_29, %c1_30, %c0_31, %c0_32, %c0_33], %36 {strides = array<i32>} : memref<1x1x3x3x8x128xf32, #tpu.memory_space<vmem>>, vector<1x1x1x1x8x128xf32>,
        %c0_34 = arith.constant 0 : index
        %c0_35 = arith.constant 0 : index
        %c2 = arith.constant 2 : index
        %c0_36 = arith.constant 0 : index
        %c0_37 = arith.constant 0 : index
        %c0_38 = arith.constant 0 : index
        %37 = vector.load %arg5[%c0_34, %c0_35, %c2, %c0_36, %c0_37, %c0_38] : memref<1x1x3x3x8x128xf32, #tpu.memory_space<vmem>>, vector<1x1x1x1x8x128xf32>
        %38 = vector.shape_cast %37 : vector<1x1x1x1x8x128xf32> to vector<8x128xf32>
        %39 = arith.addf %38, %18#6 : vector<8x128xf32>
        %c0_39 = arith.constant 0 : index
        %c0_40 = arith.constant 0 : index
        %c2_41 = arith.constant 2 : index
        %c0_42 = arith.constant 0 : index
        %c0_43 = arith.constant 0 : index
        %c0_44 = arith.constant 0 : index
        %40 = vector.load %arg5[%c0_39, %c0_40, %c2_41, %c0_42, %c0_43, %c0_44] : memref<1x1x3x3x8x128xf32, #tpu.memory_space<vmem>>, vector<1x1x1x1x8x128xf32>
        %41 = vector.shape_cast %40 : vector<1x1x1x1x8x128xf32> to vector<8x128xf32>
        %42 = vector.shape_cast %39 : vector<8x128xf32> to vector<1x1x1x1x8x128xf32>
        tpu.vector_store %arg5[%c0_39, %c0_40, %c2_41, %c0_42, %c0_43, %c0_44], %42 {strides = array<i32>} : memref<1x1x3x3x8x128xf32, #tpu.memory_space<vmem>>, vector<1x1x1x1x8x128xf32>,
        %c0_45 = arith.constant 0 : index
        %c0_46 = arith.constant 0 : index
        %c0_47 = arith.constant 0 : index
        %c1_48 = arith.constant 1 : index
        %c0_49 = arith.constant 0 : index
        %c0_50 = arith.constant 0 : index
        %43 = vector.load %arg5[%c0_45, %c0_46, %c0_47, %c1_48, %c0_49, %c0_50] : memref<1x1x3x3x8x128xf32, #tpu.memory_space<vmem>>, vector<1x1x1x1x8x128xf32>
        %44 = vector.shape_cast %43 : vector<1x1x1x1x8x128xf32> to vector<8x128xf32>
        %45 = arith.addf %44, %18#1 : vector<8x128xf32>
        %c0_51 = arith.constant 0 : index
        %c0_52 = arith.constant 0 : index
        %c0_53 = arith.constant 0 : index
        %c1_54 = arith.constant 1 : index
        %c0_55 = arith.constant 0 : index
        %c0_56 = arith.constant 0 : index
        %46 = vector.load %arg5[%c0_51, %c0_52, %c0_53, %c1_54, %c0_55, %c0_56] : memref<1x1x3x3x8x128xf32, #tpu.memory_space<vmem>>, vector<1x1x1x1x8x128xf32>
        %47 = vector.shape_cast %46 : vector<1x1x1x1x8x128xf32> to vector<8x128xf32>
        %48 = vector.shape_cast %45 : vector<8x128xf32> to vector<1x1x1x1x8x128xf32>
        tpu.vector_store %arg5[%c0_51, %c0_52, %c0_53, %c1_54, %c0_55, %c0_56], %48 {strides = array<i32>} : memref<1x1x3x3x8x128xf32, #tpu.memory_space<vmem>>, vector<1x1x1x1x8x128xf32>,
        %c0_57 = arith.constant 0 : index
        %c0_58 = arith.constant 0 : index
        %c1_59 = arith.constant 1 : index
        %c1_60 = arith.constant 1 : index
        %c0_61 = arith.constant 0 : index
        %c0_62 = arith.constant 0 : index
        %49 = vector.load %arg5[%c0_57, %c0_58, %c1_59, %c1_60, %c0_61, %c0_62] : memref<1x1x3x3x8x128xf32, #tpu.memory_space<vmem>>, vector<1x1x1x1x8x128xf32>
        %50 = vector.shape_cast %49 : vector<1x1x1x1x8x128xf32> to vector<8x128xf32>
        %51 = arith.addf %50, %18#4 : vector<8x128xf32>
        %c0_63 = arith.constant 0 : index
        %c0_64 = arith.constant 0 : index
        %c1_65 = arith.constant 1 : index
        %c1_66 = arith.constant 1 : index
        %c0_67 = arith.constant 0 : index
        %c0_68 = arith.constant 0 : index
        %52 = vector.load %arg5[%c0_63, %c0_64, %c1_65, %c1_66, %c0_67, %c0_68] : memref<1x1x3x3x8x128xf32, #tpu.memory_space<vmem>>, vector<1x1x1x1x8x128xf32>
        %53 = vector.shape_cast %52 : vector<1x1x1x1x8x128xf32> to vector<8x128xf32>
        %54 = vector.shape_cast %51 : vector<8x128xf32> to vector<1x1x1x1x8x128xf32>
        tpu.vector_store %arg5[%c0_63, %c0_64, %c1_65, %c1_66, %c0_67, %c0_68], %54 {strides = array<i32>} : memref<1x1x3x3x8x128xf32, #tpu.memory_space<vmem>>, vector<1x1x1x1x8x128xf32>,
        %c0_69 = arith.constant 0 : index
        %c0_70 = arith.constant 0 : index
        %c2_71 = arith.constant 2 : index
        %c1_72 = arith.constant 1 : index
        %c0_73 = arith.constant 0 : index
        %c0_74 = arith.constant 0 : index
        %55 = vector.load %arg5[%c0_69, %c0_70, %c2_71, %c1_72, %c0_73, %c0_74] : memref<1x1x3x3x8x128xf32, #tpu.memory_space<vmem>>, vector<1x1x1x1x8x128xf32>
        %56 = vector.shape_cast %55 : vector<1x1x1x1x8x128xf32> to vector<8x128xf32>
        %57 = arith.addf %56, %18#7 : vector<8x128xf32>
        %c0_75 = arith.constant 0 : index
        %c0_76 = arith.constant 0 : index
        %c2_77 = arith.constant 2 : index
        %c1_78 = arith.constant 1 : index
        %c0_79 = arith.constant 0 : index
        %c0_80 = arith.constant 0 : index
        %58 = vector.load %arg5[%c0_75, %c0_76, %c2_77, %c1_78, %c0_79, %c0_80] : memref<1x1x3x3x8x128xf32, #tpu.memory_space<vmem>>, vector<1x1x1x1x8x128xf32>
        %59 = vector.shape_cast %58 : vector<1x1x1x1x8x128xf32> to vector<8x128xf32>
        %60 = vector.shape_cast %57 : vector<8x128xf32> to vector<1x1x1x1x8x128xf32>
        tpu.vector_store %arg5[%c0_75, %c0_76, %c2_77, %c1_78, %c0_79, %c0_80], %60 {strides = array<i32>} : memref<1x1x3x3x8x128xf32, #tpu.memory_space<vmem>>, vector<1x1x1x1x8x128xf32>,
        %c0_81 = arith.constant 0 : index
        %c0_82 = arith.constant 0 : index
        %c0_83 = arith.constant 0 : index
        %c2_84 = arith.constant 2 : index
        %c0_85 = arith.constant 0 : index
        %c0_86 = arith.constant 0 : index
        %61 = vector.load %arg5[%c0_81, %c0_82, %c0_83, %c2_84, %c0_85, %c0_86] : memref<1x1x3x3x8x128xf32, #tpu.memory_space<vmem>>, vector<1x1x1x1x8x128xf32>
        %62 = vector.shape_cast %61 : vector<1x1x1x1x8x128xf32> to vector<8x128xf32>
        %63 = arith.addf %62, %18#2 : vector<8x128xf32>
        %c0_87 = arith.constant 0 : index
        %c0_88 = arith.constant 0 : index
        %c0_89 = arith.constant 0 : index
        %c2_90 = arith.constant 2 : index
        %c0_91 = arith.constant 0 : index
        %c0_92 = arith.constant 0 : index
        %64 = vector.load %arg5[%c0_87, %c0_88, %c0_89, %c2_90, %c0_91, %c0_92] : memref<1x1x3x3x8x128xf32, #tpu.memory_space<vmem>>, vector<1x1x1x1x8x128xf32>
        %65 = vector.shape_cast %64 : vector<1x1x1x1x8x128xf32> to vector<8x128xf32>
        %66 = vector.shape_cast %63 : vector<8x128xf32> to vector<1x1x1x1x8x128xf32>
        tpu.vector_store %arg5[%c0_87, %c0_88, %c0_89, %c2_90, %c0_91, %c0_92], %66 {strides = array<i32>} : memref<1x1x3x3x8x128xf32, #tpu.memory_space<vmem>>, vector<1x1x1x1x8x128xf32>,
        %c0_93 = arith.constant 0 : index
        %c0_94 = arith.constant 0 : index
        %c1_95 = arith.constant 1 : index
        %c2_96 = arith.constant 2 : index
        %c0_97 = arith.constant 0 : index
        %c0_98 = arith.constant 0 : index
        %67 = vector.load %arg5[%c0_93, %c0_94, %c1_95, %c2_96, %c0_97, %c0_98] : memref<1x1x3x3x8x128xf32, #tpu.memory_space<vmem>>, vector<1x1x1x1x8x128xf32>
        %68 = vector.shape_cast %67 : vector<1x1x1x1x8x128xf32> to vector<8x128xf32>
        %69 = arith.addf %68, %18#5 : vector<8x128xf32>
        %c0_99 = arith.constant 0 : index
        %c0_100 = arith.constant 0 : index
        %c1_101 = arith.constant 1 : index
        %c2_102 = arith.constant 2 : index
        %c0_103 = arith.constant 0 : index
        %c0_104 = arith.constant 0 : index
        %70 = vector.load %arg5[%c0_99, %c0_100, %c1_101, %c2_102, %c0_103, %c0_104] : memref<1x1x3x3x8x128xf32, #tpu.memory_space<vmem>>, vector<1x1x1x1x8x128xf32>
        %71 = vector.shape_cast %70 : vector<1x1x1x1x8x128xf32> to vector<8x128xf32>
        %72 = vector.shape_cast %69 : vector<8x128xf32> to vector<1x1x1x1x8x128xf32>
        tpu.vector_store %arg5[%c0_99, %c0_100, %c1_101, %c2_102, %c0_103, %c0_104], %72 {strides = array<i32>} : memref<1x1x3x3x8x128xf32, #tpu.memory_space<vmem>>, vector<1x1x1x1x8x128xf32>,
        %c0_105 = arith.constant 0 : index
        %c0_106 = arith.constant 0 : index
        %c2_107 = arith.constant 2 : index
        %c2_108 = arith.constant 2 : index
        %c0_109 = arith.constant 0 : index
        %c0_110 = arith.constant 0 : index
        %73 = vector.load %arg5[%c0_105, %c0_106, %c2_107, %c2_108, %c0_109, %c0_110] : memref<1x1x3x3x8x128xf32, #tpu.memory_space<vmem>>, vector<1x1x1x1x8x128xf32>
        %74 = vector.shape_cast %73 : vector<1x1x1x1x8x128xf32> to vector<8x128xf32>
        %75 = arith.addf %74, %18#8 : vector<8x128xf32>
        %c0_111 = arith.constant 0 : index
        %c0_112 = arith.constant 0 : index
        %c2_113 = arith.constant 2 : index
        %c2_114 = arith.constant 2 : index
        %c0_115 = arith.constant 0 : index
        %c0_116 = arith.constant 0 : index
        %76 = vector.load %arg5[%c0_111, %c0_112, %c2_113, %c2_114, %c0_115, %c0_116] : memref<1x1x3x3x8x128xf32, #tpu.memory_space<vmem>>, vector<1x1x1x1x8x128xf32>
        %77 = vector.shape_cast %76 : vector<1x1x1x1x8x128xf32> to vector<8x128xf32>
        %78 = vector.shape_cast %75 : vector<8x128xf32> to vector<1x1x1x1x8x128xf32>
        tpu.vector_store %arg5[%c0_111, %c0_112, %c2_113, %c2_114, %c0_115, %c0_116], %78 {strides = array<i32>} : memref<1x1x3x3x8x128xf32, #tpu.memory_space<vmem>>, vector<1x1x1x1x8x128xf32>,
      } else {
      }
    } else {
    }
    return
  }
  func.func @transform_0(%arg0: i32, %arg1: i32, %arg2: i32) -> (i32, i32, i32, i32) {
    %c1_i32 = arith.constant 1 : i32
    %0 = arith.muli %arg1, %c1_i32 : i32
    %1 = arith.addi %0, %arg2 : i32
    %c0_i32 = arith.constant 0 : i32
    %c0_i32_0 = arith.constant 0 : i32
    %c0_i32_1 = arith.constant 0 : i32
    return %arg0, %c0_i32, %1, %c0_i32_0 : i32, i32, i32, i32
  }
  func.func @transform_1(%arg0: i32, %arg1: i32, %arg2: i32) -> (i32, i32, i32, i32) {
    %c1_i32 = arith.constant 1 : i32
    %0 = arith.muli %arg1, %c1_i32 : i32
    %1 = arith.addi %0, %arg2 : i32
    %c0_i32 = arith.constant 0 : i32
    %c0_i32_0 = arith.constant 0 : i32
    %c0_i32_1 = arith.constant 0 : i32
    return %arg0, %c0_i32, %1, %c0_i32_0 : i32, i32, i32, i32
  }
  func.func @transform_2(%arg0: i32, %arg1: i32, %arg2: i32) -> (i32, i32, i32, i32, i32, i32) {
    %c0_i32 = arith.constant 0 : i32
    %c0_i32_0 = arith.constant 0 : i32
    %c0_i32_1 = arith.constant 0 : i32
    %c0_i32_2 = arith.constant 0 : i32
    %c0_i32_3 = arith.constant 0 : i32
    return %arg0, %arg1, %c0_i32, %c0_i32_0, %c0_i32_1, %c0_i32_2 : i32, i32, i32, i32, i32, i32
  }
}

</mosaic_0001>

<bundles_post_ra>
// kernel: tpu_custom_call.1
= control target key start
LH: loop header
LB: loop body
LE: loop exit
PB: predicated region body
PF: predicated region fallthrough
CT: control target
= control target key end

     0   :  { %7 = vsyncpa [#allocation5], 0  ;;  %s2659_s0 = inlined_call_operand.vmem [shape: f32[2,4,65,128], index: 0, kind: input, shape index: {}]   ;;  %s2660_s1 = inlined_call_operand.vmem [shape: f32[2,4,65,128], index: 1, kind: input, shape index: {}]   ;;  %s2661_s2 = inlined_call_operand.hbm [shape: f32[2,2,3,3,8,128], index: 2, kind: output, shape index: {}]  }
   0x1   :  { %9 = vsyncpa [#allocation5 + $0x1], 0  ;;  %s2116_s9 = smov 0   ;;  %s2118_s10 = smov 0  }
   0x2   :  { %s2120_s11 = smov 0   ;;  %s2122_s12 = smov 0  }
   0x3   :  { %s2124_s13 = smov 0   ;;  %s2126_s14 = smov 0  }
   0x4   :  { %s2128_s15 = smov 0   ;;  %s2130_s16 = smov 0  }
   0x5 LB: > { %s1228_s17 = sadd.s32 4294967295, %s1950_s16   ;;  %s1229_s18 = sadd.s32 4294967294, %s1950_s16   ;;  %s1950_s16 = sphi %s2130_s16, %s15_s16   ;;  %s1946_s15 = sphi %s2128_s15, %s2700_s15   ;;  %s1942_s14 = sphi %s2126_s14, %s2699_s14   ;;  %s1938_s13 = sphi %s2124_s13, %s2698_s13   ;;  %s1934_s12 = sphi %s2122_s12, %s2697_s12   ;;  %s1930_s11 = sphi %s2120_s11, %s2696_s11   ;;  %s1926_s10 = sphi %s2118_s10, %s2695_s10   ;;  %s1922_s9 = sphi %s2116_s9, %s2694_s9  }
   0x6   : > { %s30_s19 = sadd.s32 1, %s1942_s14  ;;  %s34_s20 = sadd.s32 1, %s1946_s15 }
   0x7   : > { %p32_p0 = scmp.ge.s32.totalorder %s30_s19, 2  ;;  %p52_p1 = scmp.ne.s32.totalorder %s1930_s11, %s1926_s10 }
   0x8   : > { %p53_p2 = scmp.eq.s32.totalorder %s1950_s16, 0  ;;  %p114_p5 = scmp.eq.s32.totalorder %s1228_s17, 3 }
   0x9   : > { %s2702_s19 = smov (%p32_p0, %s30_s19), 0  ;;  %s2704_s20 = smov (!%p32_p0, %s34_s20), %s1946_s15 }
   0xa   : > { %s41_s21 = ssub.s32 %s1942_s14, %s2702_s19  ;;  %p2168_p3 = por %p53_p2, %p52_p1 }
   0xb   : > { %p36_p4 = scmp.ge.s32.totalorder %s2704_s20, 2  ;;  %p119_p6 = scmp.ne.s32.totalorder %s1926_s10, %s1922_s9 }
   0xc   : > { %p120_p7 = scmp.eq.s32.totalorder %s1229_s18, 3  ;;  %p2176_p8 = por %p114_p5, %p52_p1 }
   0xd   : > { %s2706_s20 = smov (%p36_p4, %s2704_s20), 0  ;;  %s45_s27 = sadd.s32 1, %s1930_s11 }
   0xe   : > { %p2180_p9 = por %p120_p7, %p119_p6  ;;  %s40_s25 = ssub.s32 %s1946_s15, %s2706_s20 }
   0xf   : > { %s42_s26 = sor.u32 %s41_s21, %s40_s25  ;;  %p1231_p11 = scmp.ge.s32.totalorder %s1950_s16, 4 }
  0x10   : > { %p43_p10 = scmp.eq.s32.totalorder %s42_s26, 0 }
  0x11   : > { %136 = sbr.rel (%p1231_p11) target bundleno = 164 (0xa4), region = 16 }
  0x12   : > { %s2188_s28 = scalar_select %p43_p10, %s1930_s11, %s45_s27  }
  0x18   : > { %139 = sbr.rel (!%p2168_p3) target bundleno = 94 (0x5e), region = 20  ;;  %s141_s29 = sand.u32 (%p2168_p3), 1, %s1930_s11  }
  0x19   : > { %s145_s30 = smul.u32 (%p2168_p3), 5, %s1942_s14 }
  0x1a   : > { %s1331_s3 = smul.u32 (%p2168_p3), 160, %s141_s29 }
  0x1b   : > { %s146_s4 = ssub.s32 (%p2168_p3), 9, %s145_s30  ;;  %s1332_s5 = smul.u32 (%p2168_p3), 36, %s1946_s15 }
  0x1c   : > { %p147_p12 = scmp.lt.s32.totalorder (%p2168_p3), %s146_s4, 5  ;;  %s2204_s25 = scalar_lea.vmem (%p2168_p3), [#allocation2], %s1331_s3  }
  0x1d   : > { %s152_s6 = sadd.s32 (%p2168_p3), %s1332_s5, %s145_s30 }
  0x1e   : > { %s1234_s7 = sshll.u32 (%p2168_p3), %s152_s6, 3 }
  0x1f   : > { %s2708_s4 = smov (!%p147_p12, %s146_s4), 5  ;;  %s2202_s21 = scalar_lea.vmem %s2659_s0, %s1234_s7  }
  0x20   : > { %s1232_s8 = sshll.u32 %s2708_s4, 9 }
  0x21   : > { %p1235_p13 = scmp.eq.s32.totalorder %s1232_s8, 0 }
  0x22   : > { %1704 = sdivrem.u32 (!%p1235_p13), %s2708_s4, 5 }
  0x23   : > { %157 = sbr.rel (%p1235_p13) target bundleno = 94 (0x5e), region = 24 }
  0x2b   : > { %s2207_s26 = spop.drf %1704 }
  0x2c   : > { %p1236_p0 = scmp.le.s32.totalorder %s2207_s26, 0 }
  0x2d   : > { %s2665_s27 = smov (!%p1236_p0), %s2204_s25  ;;  %s2666_s29 = smov (!%p1236_p0), %s2202_s21 }
  0x2e   : > { %1072 = sbr.rel (%p1236_p0) target bundleno = 65 (0x41), region = 274  ;;  %s2216_s30 = smov (!%p1236_p0), 0  }
  0x2f   : > { %s2218_s5 = smov (!%p1236_p0), 0  }
  0x35 LB: >> { %v265_v0 = vld [vmem:[%s1958_s29] sm:$0xff]  ;;  %v267_v1 = vld [vmem:[%s1958_s29 + $0x8] sm:$0xff]  ;;  %v269_v2 = vld [vmem:[%s1958_s29 + $0x10] sm:$0xff]  ;;  %s305_s3 = sadd.s32 1, %s1962_s30  ;;  %s259_s5 = sadd.s32 1, %s1966_s5   ;;  %s1966_s5 = sphi %s2218_s5, %s259_s5   ;;  %s1962_s30 = sphi %s2216_s30, %s2667_s30   ;;  %s1958_s29 = sphi %s2666_s29, %s310_s29   ;;  %s1954_s27 = sphi %s2665_s27, %s311_s27  }
  0x36   : >> { %266 = vst [vmem:[%s1954_s27] sm:$0xff] %v265_v0  ;;  %268 = vst [vmem:[%s1954_s27 + $0x8] sm:$0xff] %v267_v1  ;;  %v271_v3 = vld [vmem:[%s1958_s29 + $0x18] sm:$0xff]  ;;  %v273_v4 = vld [vmem:[%s1958_s29 + $0x20] sm:$0xff]  ;;  %p306_p1 = scmp.ge.s32.totalorder %s305_s3, %s2207_s26  ;;  %p258_p2 = scmp.ge.s32.totalorder %s259_s5, %s2207_s26 }
  0x37   : >> { %270 = vst [vmem:[%s1954_s27 + $0x10] sm:$0xff] %v269_v2  ;;  %v275_v5 = vld [vmem:[%s1958_s29 + $0x48] sm:$0xff]  ;;  %272 = vst [vmem:[%s1954_s27 + $0x18] sm:$0xff] %v271_v3  ;;  %v277_v6 = vld [vmem:[%s1958_s29 + $0x50] sm:$0xff] }
  0x38   : >> { %274 = vst [vmem:[%s1954_s27 + $0x20] sm:$0xff] %v273_v4  ;;  %276 = vst [vmem:[%s1954_s27 + $0x28] sm:$0xff] %v275_v5  ;;  %v279_v7 = vld [vmem:[%s1958_s29 + $0x58] sm:$0xff]  ;;  %v281_v8 = vld [vmem:[%s1958_s29 + $0x60] sm:$0xff]  ;;  %s2710_s3 = smov (%p306_p1, %s305_s3), 0 }
  0x39   : >> { %278 = vst [vmem:[%s1954_s27 + $0x30] sm:$0xff] %v277_v6  ;;  %280 = vst [vmem:[%s1954_s27 + $0x38] sm:$0xff] %v279_v7  ;;  %v283_v9 = vld [vmem:[%s1958_s29 + $0x68] sm:$0xff]  ;;  %v285_v10 = vld [vmem:[%s1958_s29 + $0x90] sm:$0xff]  ;;  %s308_s6 = smul.u32 40, %s2710_s3  ;;  %s2667_s30 = smov %s2710_s3 }
  0x3a   : >> { %282 = vst [vmem:[%s1954_s27 + $0x40] sm:$0xff] %v281_v8  ;;  %v287_v11 = vld [vmem:[%s1958_s29 + $0x98] sm:$0xff]  ;;  %284 = vst [vmem:[%s1954_s27 + $0x48] sm:$0xff] %v283_v9  ;;  %v289_v12 = vld [vmem:[%s1958_s29 + $0xa0] sm:$0xff]  ;;  %261 = sbr.rel (!%p258_p2) target bundleno = 53 (0x35), region = 280 }
  0x3b   : >> { %286 = vst [vmem:[%s1954_s27 + $0x50] sm:$0xff] %v285_v10  ;;  %288 = vst [vmem:[%s1954_s27 + $0x58] sm:$0xff] %v287_v11  ;;  %v291_v13 = vld [vmem:[%s1958_s29 + $0xa8] sm:$0xff]  ;;  %v293_v14 = vld [vmem:[%s1958_s29 + $0xb0] sm:$0xff] }
  0x3c   : >> { %290 = vst [vmem:[%s1954_s27 + $0x60] sm:$0xff] %v289_v12  ;;  %292 = vst [vmem:[%s1954_s27 + $0x68] sm:$0xff] %v291_v13  ;;  %v295_v15 = vld [vmem:[%s1958_s29 + $0xd8] sm:$0xff]  ;;  %v297_v16 = vld [vmem:[%s1958_s29 + $0xe0] sm:$0xff] }
  0x3d   : >> { %294 = vst [vmem:[%s1954_s27 + $0x70] sm:$0xff] %v293_v14  ;;  %v299_v17 = vld [vmem:[%s1958_s29 + $0xe8] sm:$0xff]  ;;  %296 = vst [vmem:[%s1954_s27 + $0x78] sm:$0xff] %v295_v15  ;;  %v301_v18 = vld [vmem:[%s1958_s29 + $0xf0] sm:$0xff] }
  0x3e   : >> { %298 = vst [vmem:[%s1954_s27 + $0x80] sm:$0xff] %v297_v16  ;;  %300 = vst [vmem:[%s1954_s27 + $0x88] sm:$0xff] %v299_v17  ;;  %v303_v19 = vld [vmem:[%s1958_s29 + $0xf8] sm:$0xff]  ;;  %s310_s29 = scalar_lea.vmem %s2202_s21, %s308_s6  }
  0x3f   : >> { %302 = vst [vmem:[%s1954_s27 + $0x90] sm:$0xff] %v301_v18  ;;  %304 = vst [vmem:[%s1954_s27 + $0x98] sm:$0xff] %v303_v19  ;;  %s311_s27 = scalar_lea.vmem %s2204_s25, %s308_s6 [#allocation2]  }
  0x41 PF: > { %1706 = sdivrem.u32 %s2708_s4, 5 }
  0x42   : > { %s1237_s7 = smul.u32 40, %s2207_s26 }
  0x44   : > { %s2286_s8 = scalar_lea.vmem %s2202_s21, %s1237_s7   ;;  %s2289_s17 = scalar_lea.vmem %s2204_s25, %s1237_s7 [#allocation2]  }
  0x4a   : > { %s2291_s18 = spop.drf %1706 }
  0x4b   : > { %p1239_p4 = scmp.le.s32.totalorder %s2291_s18, 0 }
  0x4c   : > { %s2668_s5 = smov (!%p1239_p4), %s2289_s17  ;;  %s2669_s27 = smov (!%p1239_p4), %s2286_s8 }
  0x4d   : > { %1086 = sbr.rel (%p1239_p4) target bundleno = 94 (0x5e), region = 285  ;;  %s1976_s29 = smov (!%p1239_p4), 0  }
  0x4e   : > { %s1980_s30 = smov (!%p1239_p4), 0  }
  0x54 LB: >> { %v328_v20 = vld [vmem:[%s1974_s27] sm:$0xff]  ;;  %v330_v21 = vld [vmem:[%s1974_s27 + $0x48] sm:$0xff]  ;;  %v332_v22 = vld [vmem:[%s1974_s27 + $0x90] sm:$0xff]  ;;  %s336_s4 = sadd.s32 1, %s1978_s29  ;;  %s322_s30 = sadd.s32 1, %s1982_s30   ;;  %s1982_s30 = sphi %s1980_s30, %s322_s30   ;;  %s1978_s29 = sphi %s1976_s29, %s1977_s29   ;;  %s1974_s27 = sphi %s2669_s27, %s341_s27   ;;  %s1970_s5 = sphi %s2668_s5, %s342_s5  }
  0x55   : >> { %329 = vst [vmem:[%s1970_s5] sm:$0xff] %v328_v20  ;;  %331 = vst [vmem:[%s1970_s5 + $0x28] sm:$0xff] %v330_v21  ;;  %v334_v23 = vld [vmem:[%s1974_s27 + $0xd8] sm:$0xff]  ;;  %p337_p5 = scmp.ge.s32.totalorder %s336_s4, %s2291_s18  ;;  %p321_p6 = scmp.ge.s32.totalorder %s322_s30, %s2291_s18 }
  0x56   : >> { %333 = vst [vmem:[%s1970_s5 + $0x50] sm:$0xff] %v332_v22  ;;  %335 = vst [vmem:[%s1970_s5 + $0x78] sm:$0xff] %v334_v23 }
  0x57   : >> { %s2712_s4 = smov (%p337_p5, %s336_s4), 0  ;;  %324 = sbr.rel (!%p321_p6) target bundleno = 84 (0x54), region = 291 }
  0x58   : >> { %s1240_s21 = sshll.u32 %s2712_s4, 3  ;;  %s1977_s29 = smov %s2712_s4  }
  0x59   : >> { %s341_s27 = scalar_lea.vmem %s2286_s8, %s1240_s21   ;;  %s342_s5 = scalar_lea.vmem %s2289_s17, %s1240_s21 [#allocation2]  }
  0x5e PF: > { %348 = sbr.rel (!%p2168_p3) target bundleno = 164 (0xa4), region = 72  ;;  %s350_s25 = sand.u32 (%p2168_p3), 1, %s1930_s11  }
  0x5f   : > { %s354_s26 = smul.u32 (%p2168_p3), 5, %s1942_s14 }
  0x60   : > { %s1333_s3 = smul.u32 (%p2168_p3), 160, %s350_s25 }
  0x61   : > { %s355_s6 = ssub.s32 (%p2168_p3), 9, %s354_s26  ;;  %s1334_s7 = smul.u32 (%p2168_p3), 36, %s1946_s15 }
  0x62   : > { %p356_p7 = scmp.lt.s32.totalorder (%p2168_p3), %s355_s6, 5  ;;  %s2323_s5 = scalar_lea.vmem (%p2168_p3), [#allocation3], %s1333_s3  }
  0x63   : > { %s361_s29 = sadd.s32 (%p2168_p3), %s1334_s7, %s354_s26 }
  0x64   : > { %s1244_s27 = sshll.u32 (%p2168_p3), %s361_s29, 3 }
  0x65   : > { %s2714_s6 = smov (!%p356_p7, %s355_s6), 5  ;;  %s2321_s22 = scalar_lea.vmem %s2660_s1, %s1244_s27  }
  0x66   : > { %s1242_s8 = sshll.u32 %s2714_s6, 9 }
  0x67   : > { %p1245_p3 = scmp.eq.s32.totalorder %s1242_s8, 0 }
  0x68   : > { %1708 = sdivrem.u32 (!%p1245_p3), %s2714_s6, 5 }
  0x69   : > { %366 = sbr.rel (%p1245_p3) target bundleno = 164 (0xa4), region = 76 }
  0x71   : > { %s2326_s30 = spop.drf %1708 }
  0x72   : > { %p1246_p10 = scmp.le.s32.totalorder %s2326_s30, 0 }
  0x73   : > { %s2670_s4 = smov (!%p1246_p10), %s2323_s5  ;;  %s2671_s21 = smov (!%p1246_p10), %s2321_s22 }
  0x74   : > { %1100 = sbr.rel (%p1246_p10) target bundleno = 135 (0x87), region = 296  ;;  %s2335_s25 = smov (!%p1246_p10), 0  }
  0x75   : > { %s2337_s26 = smov (!%p1246_p10), 0  }
  0x7b LB: >> { %v474_v24 = vld [vmem:[%s1990_s21] sm:$0xff]  ;;  %v476_v25 = vld [vmem:[%s1990_s21 + $0x8] sm:$0xff]  ;;  %v478_v26 = vld [vmem:[%s1990_s21 + $0x10] sm:$0xff]  ;;  %s514_s3 = sadd.s32 1, %s1994_s25  ;;  %s468_s26 = sadd.s32 1, %s1998_s26   ;;  %s1998_s26 = sphi %s2337_s26, %s468_s26   ;;  %s1994_s25 = sphi %s2335_s25, %s2672_s25   ;;  %s1990_s21 = sphi %s2671_s21, %s519_s21   ;;  %s1986_s4 = sphi %s2670_s4, %s520_s4  }
  0x7c   : >> { %475 = vst [vmem:[%s1986_s4] sm:$0xff] %v474_v24  ;;  %477 = vst [vmem:[%s1986_s4 + $0x8] sm:$0xff] %v476_v25  ;;  %v480_v27 = vld [vmem:[%s1990_s21 + $0x18] sm:$0xff]  ;;  %v482_v28 = vld [vmem:[%s1990_s21 + $0x20] sm:$0xff]  ;;  %p515_p11 = scmp.ge.s32.totalorder %s514_s3, %s2326_s30  ;;  %p467_p12 = scmp.ge.s32.totalorder %s468_s26, %s2326_s30 }
  0x7d   : >> { %479 = vst [vmem:[%s1986_s4 + $0x10] sm:$0xff] %v478_v26  ;;  %v484_v29 = vld [vmem:[%s1990_s21 + $0x48] sm:$0xff]  ;;  %481 = vst [vmem:[%s1986_s4 + $0x18] sm:$0xff] %v480_v27  ;;  %v486_v30 = vld [vmem:[%s1990_s21 + $0x50] sm:$0xff] }
  0x7e   : >> { %483 = vst [vmem:[%s1986_s4 + $0x20] sm:$0xff] %v482_v28  ;;  %485 = vst [vmem:[%s1986_s4 + $0x28] sm:$0xff] %v484_v29  ;;  %v488_v31 = vld [vmem:[%s1990_s21 + $0x58] sm:$0xff]  ;;  %v490_v32 = vld [vmem:[%s1990_s21 + $0x60] sm:$0xff]  ;;  %s2716_s3 = smov (%p515_p11, %s514_s3), 0 }
  0x7f   : >> { %487 = vst [vmem:[%s1986_s4 + $0x30] sm:$0xff] %v486_v30  ;;  %489 = vst [vmem:[%s1986_s4 + $0x38] sm:$0xff] %v488_v31  ;;  %v492_v33 = vld [vmem:[%s1990_s21 + $0x68] sm:$0xff]  ;;  %v494_v34 = vld [vmem:[%s1990_s21 + $0x90] sm:$0xff]  ;;  %s517_s7 = smul.u32 40, %s2716_s3  ;;  %s2672_s25 = smov %s2716_s3 }
  0x80   : >> { %491 = vst [vmem:[%s1986_s4 + $0x40] sm:$0xff] %v490_v32  ;;  %v496_v35 = vld [vmem:[%s1990_s21 + $0x98] sm:$0xff]  ;;  %493 = vst [vmem:[%s1986_s4 + $0x48] sm:$0xff] %v492_v33  ;;  %v498_v36 = vld [vmem:[%s1990_s21 + $0xa0] sm:$0xff]  ;;  %470 = sbr.rel (!%p467_p12) target bundleno = 123 (0x7b), region = 302 }
  0x81   : >> { %495 = vst [vmem:[%s1986_s4 + $0x50] sm:$0xff] %v494_v34  ;;  %497 = vst [vmem:[%s1986_s4 + $0x58] sm:$0xff] %v496_v35  ;;  %v500_v37 = vld [vmem:[%s1990_s21 + $0xa8] sm:$0xff]  ;;  %v502_v38 = vld [vmem:[%s1990_s21 + $0xb0] sm:$0xff] }
  0x82   : >> { %499 = vst [vmem:[%s1986_s4 + $0x60] sm:$0xff] %v498_v36  ;;  %501 = vst [vmem:[%s1986_s4 + $0x68] sm:$0xff] %v500_v37  ;;  %v504_v39 = vld [vmem:[%s1990_s21 + $0xd8] sm:$0xff]  ;;  %v506_v40 = vld [vmem:[%s1990_s21 + $0xe0] sm:$0xff] }
  0x83   : >> { %503 = vst [vmem:[%s1986_s4 + $0x70] sm:$0xff] %v502_v38  ;;  %v508_v41 = vld [vmem:[%s1990_s21 + $0xe8] sm:$0xff]  ;;  %505 = vst [vmem:[%s1986_s4 + $0x78] sm:$0xff] %v504_v39  ;;  %v510_v42 = vld [vmem:[%s1990_s21 + $0xf0] sm:$0xff] }
  0x84   : >> { %507 = vst [vmem:[%s1986_s4 + $0x80] sm:$0xff] %v506_v40  ;;  %509 = vst [vmem:[%s1986_s4 + $0x88] sm:$0xff] %v508_v41  ;;  %v512_v43 = vld [vmem:[%s1990_s21 + $0xf8] sm:$0xff]  ;;  %s519_s21 = scalar_lea.vmem %s2321_s22, %s517_s7  }
  0x85   : >> { %511 = vst [vmem:[%s1986_s4 + $0x90] sm:$0xff] %v510_v42  ;;  %513 = vst [vmem:[%s1986_s4 + $0x98] sm:$0xff] %v512_v43  ;;  %s520_s4 = scalar_lea.vmem %s2323_s5, %s517_s7 [#allocation3]  }
  0x87 PF: > { %1710 = sdivrem.u32 %s2714_s6, 5 }
  0x88   : > { %s1247_s29 = smul.u32 40, %s2326_s30 }
  0x8a   : > { %s2405_s27 = scalar_lea.vmem %s2321_s22, %s1247_s29   ;;  %s2408_s8 = scalar_lea.vmem %s2323_s5, %s1247_s29 [#allocation3]  }
  0x90   : > { %s2410_s17 = spop.drf %1710 }
  0x91   : > { %p1249_p13 = scmp.le.s32.totalorder %s2410_s17, 0 }
  0x92   : > { %s2673_s18 = smov (!%p1249_p13), %s2408_s8  ;;  %s2674_s4 = smov (!%p1249_p13), %s2405_s27 }
  0x93   : > { %1114 = sbr.rel (%p1249_p13) target bundleno = 164 (0xa4), region = 307  ;;  %s2008_s21 = smov (!%p1249_p13), 0  }
  0x94   : > { %s2012_s25 = smov (!%p1249_p13), 0  }
  0x9a LB: >> { %v537_v44 = vld [vmem:[%s2006_s4] sm:$0xff]  ;;  %v539_v45 = vld [vmem:[%s2006_s4 + $0x48] sm:$0xff]  ;;  %v541_v46 = vld [vmem:[%s2006_s4 + $0x90] sm:$0xff]  ;;  %s545_s6 = sadd.s32 1, %s2010_s21  ;;  %s531_s25 = sadd.s32 1, %s2014_s25   ;;  %s2014_s25 = sphi %s2012_s25, %s531_s25   ;;  %s2010_s21 = sphi %s2008_s21, %s2009_s21   ;;  %s2006_s4 = sphi %s2674_s4, %s550_s4   ;;  %s2002_s18 = sphi %s2673_s18, %s551_s18  }
  0x9b   : >> { %538 = vst [vmem:[%s2002_s18] sm:$0xff] %v537_v44  ;;  %540 = vst [vmem:[%s2002_s18 + $0x28] sm:$0xff] %v539_v45  ;;  %v543_v47 = vld [vmem:[%s2006_s4 + $0xd8] sm:$0xff]  ;;  %p546_p0 = scmp.ge.s32.totalorder %s545_s6, %s2410_s17  ;;  %p530_p1 = scmp.ge.s32.totalorder %s531_s25, %s2410_s17 }
  0x9c   : >> { %542 = vst [vmem:[%s2002_s18 + $0x50] sm:$0xff] %v541_v46  ;;  %544 = vst [vmem:[%s2002_s18 + $0x78] sm:$0xff] %v543_v47 }
  0x9d   : >> { %s2718_s6 = smov (%p546_p0, %s545_s6), 0  ;;  %533 = sbr.rel (!%p530_p1) target bundleno = 154 (0x9a), region = 313 }
  0x9e   : >> { %s1250_s22 = sshll.u32 %s2718_s6, 3  ;;  %s2009_s21 = smov %s2718_s6  }
  0x9f   : >> { %s550_s4 = scalar_lea.vmem %s2405_s27, %s1250_s22   ;;  %s551_s18 = scalar_lea.vmem %s2408_s8, %s1250_s22 [#allocation3]  }
  0xa4 PF: > { %p1252_p2 = scmp.ge.s32.totalorder %s1950_s16, 1  ;;  %p556_p4 = scmp.lt.s32.totalorder %s1950_s16, 5 }
  0xa6   : > { %p557_p5 = pnand %p1252_p2, %p556_p4 }
  0xa7   : > { %s2432_s5 = sand.u32 (!%p557_p5), 1, %s1926_s10   ;;  %s2435_s30 = smul.u32 (!%p557_p5), 40, %s1934_s12 }
  0xa8   : > { %560 = sbr.rel (%p557_p5) target bundleno = 280 (0x118), region = 124 }
  0xa9   : > { %s1335_s26 = smul.u32 (!%p557_p5), 160, %s2432_s5  ;;  %s609_s7 = sadd.s32 (!%p557_p5), 40, %s2435_s30 }
  0xaa   : > { %s1336_s3 = smul.u32 (!%p557_p5), 72, %s2432_s5  ;;  %p611_p6 = scmp.lt.s32.totalorder (!%p557_p5), %s2435_s30, 65 }
  0xab   : > { %s2441_s29 = scalar_lea.vmem (!%p557_p5), [#allocation2], %s1335_s26  ;;  %s2443_s27 = scalar_lea.vmem (!%p557_p5), [#allocation3], %s1335_s26 }
  0xac   : > { %s2445_s8 = scalar_lea.vmem (!%p557_p5), [#allocation4], %s1336_s3  ;;  %p2447_p7 = scmp.gt.s32.totalorder (!%p557_p5), %s609_s7, 65 }
  0xaf   : > { %614 = sbr.rel (%p2447_p7) target bundleno = 211 (0xd3), region = 136  ;;  %v2453_v48 = vmov (!%p2447_p7), 0.0   ;;  %v2455_v49 = vmov (!%p2447_p7), 0.0   ;;  %v2457_v50 = vmov (!%p2447_p7), 0.0   ;;  %v2459_v51 = vmov (!%p2447_p7), 0.0   ;;  %s2471_s18 = smov (!%p2447_p7), 0  }
  0xb0   : > { %v2461_v52 = vmov (!%p2447_p7), 0.0   ;;  %v2463_v53 = vmov (!%p2447_p7), 0.0   ;;  %v2465_v54 = vmov (!%p2447_p7), 0.0   ;;  %v2467_v55 = vmov (!%p2447_p7), 0.0  }
  0xb1   : > { %v2469_v56 = vmov (!%p2447_p7), 0.0  }
  0xb6 LB: >> { %s1254_s4 = sshll.u32 %s2054_s18, 3  ;;  %v2096_v12 = vmov 0.0   ;;  %s620_s18 = sadd.s32 1, %s2054_s18   ;;  %s2054_s18 = sphi %s2471_s18, %s620_s18   ;;  %v2050_v56 = vphi %v2469_v56, %v2684_v56   ;;  %v2046_v55 = vphi %v2467_v55, %v2683_v55   ;;  %v2042_v54 = vphi %v2465_v54, %v2682_v54   ;;  %v2038_v53 = vphi %v2463_v53, %v2681_v53   ;;  %v2034_v52 = vphi %v2461_v52, %v2680_v52   ;;  %v2030_v51 = vphi %v2459_v51, %v2679_v51   ;;  %v2026_v50 = vphi %v2457_v50, %v2678_v50   ;;  %v2022_v49 = vphi %v2455_v49, %v2677_v49   ;;  %v2018_v48 = vphi %v2453_v48, %v2676_v48  }
  0xb7   : >> { %s631_s21 = scalar_lea.vmem %s2441_s29, %s1254_s4 [#allocation2]  ;;  %s1028_s25 = scalar_lea.vmem %s2443_s27, %s1254_s4 [#allocation3] }
  0xb8   : >> { %v632_v57 = vld [vmem:[%s631_s21] sm:$0xff]  ;;  %v1256_v58 = vld [vmem:[%s631_s21 + $0x28] sm:$0xff]  ;;  %v1258_v59 = vld [vmem:[%s631_s21 + $0x50] sm:$0xff]  ;;  %p617_p3 = scmp.ge.s32.totalorder %s620_s18, 5  }
  0xb9   : >> { %v642_v60 = vmax.f32 %v632_v57, %v1256_v58  ;;  %v1262_v61 = vld [vmem:[%s1028_s25 + $0x28] sm:$0xff]  ;;  %v1264_v62 = vld [vmem:[%s1028_s25 + $0x50] sm:$0xff]  ;;  %v1260_v63 = vld [vmem:[%s631_s21 + $0x78] sm:$0xff] }
  0xba   : >> { %v656_v0 = vmul.f32 %v1262_v61, %v1256_v58  ;;  %v658_v1 = vadd.f32 %v2038_v53, %v1262_v61   ;;  %v670_v2 = vmul.f32 %v1264_v62, %v1258_v59  ;;  %v1266_v3 = vld [vmem:[%s1028_s25 + $0x78] sm:$0xff]  ;;  %v672_v5 = vadd.f32 %v2034_v52, %v1264_v62  }
  0xbb   : >> { %v643_v4 = vmax.f32 %v642_v60, %v1258_v59  ;;  %v683_v6 = vmul.f32 %v1266_v3, %v1260_v63  ;;  %v685_v9 = vadd.f32 %v2030_v51, %v1266_v3   ;;  %v659_v19 = vadd.f32 %v1262_v61, %v1256_v58 }
  0xbc   : >> { %v657_v7 = vadd.f32 %v2050_v56, %v656_v0   ;;  %v671_v8 = vadd.f32 %v2046_v55, %v670_v2   ;;  %v673_v25 = vadd.f32 %v1264_v62, %v1258_v59  ;;  %v686_v32 = vadd.f32 %v1266_v3, %v1260_v63  ;;  %1267 = vst [vmem:[%s2445_s8 + $0x18] sm:$0xff] (%p617_p3), %v658_v1 }
  0xbd   : >> { %v644_v10 = vmax.f32 %v643_v4, %v1260_v63  ;;  %v684_v11 = vadd.f32 %v2042_v54, %v683_v6   ;;  %v2679_v51 = vmov %v685_v9  ;;  %v2680_v52 = vmov %v672_v5  ;;  %1270 = vst [vmem:[%s2445_s8 + $0x20] sm:$0xff] (%p617_p3), %v672_v5  ;;  %1273 = vst [vmem:[%s2445_s8 + $0x28] sm:$0xff] (%p617_p3), %v685_v9 }
  0xbe   : >> { %v2681_v53 = vmov %v658_v1  ;;  %v2683_v55 = vmov %v671_v8  ;;  %v2684_v56 = vmov %v657_v7  ;;  %693 = vst [vmem:[%s2445_s8] sm:$0xff] (%p617_p3), %v657_v7  ;;  %1269 = vst [vmem:[%s2445_s8 + $0x8] sm:$0xff] (%p617_p3), %v671_v8 }
  0xbf   : >> { %vm645_vm0 = vcmp.eq.f32.partialorder %v632_v57, %v644_v10  ;;  %vm648_vm1 = vcmp.eq.f32.partialorder %v1256_v58, %v644_v10  ;;  %vm662_vm2 = vcmp.eq.f32.partialorder %v1258_v59, %v644_v10  ;;  %vm676_vm3 = vcmp.eq.f32.partialorder %v1260_v63, %v644_v10  ;;  %1272 = vst [vmem:[%s2445_s8 + $0x10] sm:$0xff] (%p617_p3), %v684_v11 }
  0xc0   : >> { %v646_v13 = vsel %vm645_vm0, 1.0, %v2096_v12  ;;  %v2682_v54 = vmov %v684_v11 }
  0xc1   : >> { %v647_v14 = vsub.f32 1.0, %v646_v13 }
  0xc3   : >> { %v649_v15 = vsel %vm648_vm1, %v647_v14, 0.0 }
  0xc4   : >> { %v650_v16 = vsub.f32 %v647_v14, %v649_v15  ;;  %v653_v17 = vadd.f32 %v1262_v61, %v649_v15  ;;  %v654_v18 = vmul.f32 %v1262_v61, %v649_v15 }
  0xc6   : >> { %v655_v20 = vsub.f32 %v653_v17, %v654_v18  ;;  %v663_v21 = vsel %vm662_vm2, %v650_v16, 0.0 }
  0xc7   : >> { %v664_v22 = vsub.f32 %v650_v16, %v663_v21  ;;  %v667_v23 = vadd.f32 %v1264_v62, %v663_v21  ;;  %v668_v24 = vmul.f32 %v1264_v62, %v663_v21 }
  0xc8   : >> { %v660_v26 = vmul.f32 %v659_v19, %v655_v20 }
  0xc9   : >> { %v669_v27 = vsub.f32 %v667_v23, %v668_v24  ;;  %v677_v28 = vsel %vm676_vm3, %v664_v22, 0.0 }
  0xca   : >> { %v661_v29 = vadd.f32 %v2026_v50, %v660_v26   ;;  %v680_v30 = vadd.f32 %v1266_v3, %v677_v28  ;;  %v681_v31 = vmul.f32 %v1266_v3, %v677_v28 }
  0xcb   : >> { %v674_v33 = vmul.f32 %v673_v25, %v669_v27 }
  0xcc   : >> { %v682_v34 = vsub.f32 %v680_v30, %v681_v31  ;;  %v2678_v50 = vmov %v661_v29  ;;  %619 = sbr.rel (!%p617_p3) target bundleno = 182 (0xb6), region = 324  ;;  %1268 = vst [vmem:[%s2445_s8 + $0x30] sm:$0xff] (%p617_p3), %v661_v29 }
  0xcd   : >> { %v675_v35 = vadd.f32 %v2022_v49, %v674_v33  }
  0xce   : >> { %v687_v36 = vmul.f32 %v686_v32, %v682_v34 }
  0xcf   : >> { %v2677_v49 = vmov %v675_v35  ;;  %1271 = vst [vmem:[%s2445_s8 + $0x38] sm:$0xff] (%p617_p3), %v675_v35 }
  0xd0   : >> { %v688_v37 = vadd.f32 %v2018_v48, %v687_v36  }
  0xd2   : >> { %v2676_v48 = vmov %v688_v37  ;;  %1274 = vst [vmem:[%s2445_s8 + $0x40] sm:$0xff] (%p617_p3), %v688_v37 }
  0xd3 PF: > { %p750_p10 = pnand %p2447_p7, %p611_p6 }
  0xd4   : > { %v754_v38 = vlaneseq (!%p750_p10)  ;;  %v2524_v40 = vmov (!%p750_p10), 0.0   ;;  %v2526_v41 = vmov (!%p750_p10), 0.0   ;;  %v2528_v42 = vmov (!%p750_p10), 0.0   ;;  %s2542_s6 = smov (!%p750_p10), 0  }
  0xd5   : > { %753 = sbr.rel (%p750_p10) target bundleno = 253 (0xfd), region = 155  ;;  %v2530_v43 = vmov (!%p750_p10), 0.0   ;;  %v2532_v44 = vmov (!%p750_p10), 0.0   ;;  %v2534_v45 = vmov (!%p750_p10), 0.0   ;;  %v2536_v46 = vmov (!%p750_p10), 0.0  }
  0xd6   : > { %v2522_v39 = vshrl.u32 (!%p750_p10), %v754_v38, 7  ;;  %v2538_v47 = vmov (!%p750_p10), 0.0   ;;  %v2540_v48 = vmov (!%p750_p10), 0.0  }
  0xdc LB: >> { %s1291_s22 = sshll.u32 %s2094_s6, 3  ;;  %v2097_v13 = vmov 0.0   ;;  %s761_s6 = sadd.s32 1, %s2094_s6   ;;  %s2094_s6 = sphi %s2542_s6, %s761_s6   ;;  %v2090_v48 = vphi %v2540_v48, %v2693_v48   ;;  %v2086_v47 = vphi %v2538_v47, %v2692_v47   ;;  %v2082_v46 = vphi %v2536_v46, %v2691_v46   ;;  %v2078_v45 = vphi %v2534_v45, %v2690_v45   ;;  %v2074_v44 = vphi %v2532_v44, %v2689_v44   ;;  %v2070_v43 = vphi %v2530_v43, %v2688_v43   ;;  %v2066_v42 = vphi %v2528_v42, %v2687_v42   ;;  %v2062_v41 = vphi %v2526_v41, %v2686_v41   ;;  %v2058_v40 = vphi %v2524_v40, %v2685_v40  }
  0xdd   : >> { %s772_s26 = sadd.s32 %s1291_s22, %s2435_s30  ;;  %s776_s3 = scalar_lea.vmem %s2441_s29, %s1291_s22 [#allocation2] }
  0xde   : >> { %v773_v49 = vstv %s772_s26  ;;  %s1048_s7 = scalar_lea.vmem %s2443_s27, %s1291_s22 [#allocation3]  ;;  %v777_v51 = vld [vmem:[%s776_s3] sm:$0xff]  ;;  %v1293_v52 = vld [vmem:[%s776_s3 + $0x28] sm:$0xff]  ;;  %v1295_v53 = vld [vmem:[%s776_s3 + $0x50] sm:$0xff]  ;;  %p758_p11 = scmp.ge.s32.totalorder %s761_s6, 5  }
  0xdf   : >> { %v774_v50 = vadd.s32 %v773_v49, %v2522_v39  ;;  %v1297_v54 = vld [vmem:[%s776_s3 + $0x78] sm:$0xff]  ;;  %v1299_v55 = vld [vmem:[%s1048_s7 + $0x28] sm:$0xff]  ;;  %v1301_v56 = vld [vmem:[%s1048_s7 + $0x50] sm:$0xff] }
  0xe0   : >> { %v1303_v57 = vld [vmem:[%s1048_s7 + $0x78] sm:$0xff] }
  0xe1   : >> { %vm775_vm4 = vcmp.lt.s32.totalorder %v774_v50, 65 }
  0xe2   : >> { %v778_v58 = vsel %vm775_vm4, %v777_v51, 0.0  ;;  %v782_v59 = vsel %vm775_vm4, %v1293_v52, 0.0  ;;  %v786_v60 = vsel %vm775_vm4, %v1295_v53, 0.0  ;;  %v790_v61 = vsel %vm775_vm4, %v1297_v54, 0.0 }
  0xe3   : >> { %v791_v62 = vmax.f32 %v778_v58, %v782_v59  ;;  %v802_v63 = vsel %vm775_vm4, %v1299_v55, 0.0  ;;  %v817_v0 = vsel %vm775_vm4, %v1301_v56, 0.0  ;;  %v831_v4 = vsel %vm775_vm4, %v1303_v57, 0.0 }
  0xe4   : >> { %v806_v1 = vmul.f32 %v802_v63, %v782_v59  ;;  %v808_v2 = vadd.f32 %v2078_v45, %v802_v63   ;;  %v821_v3 = vmul.f32 %v817_v0, %v786_v60  ;;  %v823_v6 = vadd.f32 %v2074_v44, %v817_v0  }
  0xe5   : >> { %v792_v5 = vmax.f32 %v791_v62, %v786_v60  ;;  %v835_v7 = vmul.f32 %v831_v4, %v790_v61  ;;  %v837_v10 = vadd.f32 %v2070_v43, %v831_v4   ;;  %v809_v20 = vadd.f32 %v802_v63, %v782_v59 }
  0xe6   : >> { %v807_v8 = vadd.f32 %v2090_v48, %v806_v1   ;;  %v822_v9 = vadd.f32 %v2086_v47, %v821_v3   ;;  %v824_v26 = vadd.f32 %v817_v0, %v786_v60  ;;  %v838_v33 = vadd.f32 %v831_v4, %v790_v61  ;;  %1304 = vst [vmem:[%s2445_s8 + $0x18] sm:$0xff] (%p758_p11), %v808_v2 }
  0xe7   : >> { %v793_v11 = vmax.f32 %v792_v5, %v790_v61  ;;  %v836_v12 = vadd.f32 %v2082_v46, %v835_v7   ;;  %v2688_v43 = vmov %v837_v10  ;;  %v2689_v44 = vmov %v823_v6  ;;  %1307 = vst [vmem:[%s2445_s8 + $0x20] sm:$0xff] (%p758_p11), %v823_v6  ;;  %1310 = vst [vmem:[%s2445_s8 + $0x28] sm:$0xff] (%p758_p11), %v837_v10 }
  0xe8   : >> { %v2690_v45 = vmov %v808_v2  ;;  %v2692_v47 = vmov %v822_v9  ;;  %v2693_v48 = vmov %v807_v8  ;;  %845 = vst [vmem:[%s2445_s8] sm:$0xff] (%p758_p11), %v807_v8  ;;  %1306 = vst [vmem:[%s2445_s8 + $0x8] sm:$0xff] (%p758_p11), %v822_v9 }
  0xe9   : >> { %vm794_vm5 = vcmp.eq.f32.partialorder %v778_v58, %v793_v11  ;;  %vm797_vm6 = vcmp.eq.f32.partialorder %v782_v59, %v793_v11  ;;  %vm812_vm7 = vcmp.eq.f32.partialorder %v786_v60, %v793_v11  ;;  %vm827_vm8 = vcmp.eq.f32.partialorder %v790_v61, %v793_v11  ;;  %1309 = vst [vmem:[%s2445_s8 + $0x10] sm:$0xff] (%p758_p11), %v836_v12 }
  0xea   : >> { %v795_v14 = vsel %vm794_vm5, 1.0, %v2097_v13  ;;  %v2691_v46 = vmov %v836_v12 }
  0xeb   : >> { %v796_v15 = vsub.f32 1.0, %v795_v14 }
  0xed   : >> { %v798_v16 = vsel %vm797_vm6, %v796_v15, 0.0 }
  0xee   : >> { %v799_v17 = vsub.f32 %v796_v15, %v798_v16  ;;  %v803_v18 = vadd.f32 %v802_v63, %v798_v16  ;;  %v804_v19 = vmul.f32 %v802_v63, %v798_v16 }
  0xf0   : >> { %v805_v21 = vsub.f32 %v803_v18, %v804_v19  ;;  %v813_v22 = vsel %vm812_vm7, %v799_v17, 0.0 }
  0xf1   : >> { %v814_v23 = vsub.f32 %v799_v17, %v813_v22  ;;  %v818_v24 = vadd.f32 %v817_v0, %v813_v22  ;;  %v819_v25 = vmul.f32 %v817_v0, %v813_v22 }
  0xf2   : >> { %v810_v27 = vmul.f32 %v809_v20, %v805_v21 }
  0xf3   : >> { %v820_v28 = vsub.f32 %v818_v24, %v819_v25  ;;  %v828_v29 = vsel %vm827_vm8, %v814_v23, 0.0 }
  0xf4   : >> { %v811_v30 = vadd.f32 %v2066_v42, %v810_v27   ;;  %v832_v31 = vadd.f32 %v831_v4, %v828_v29  ;;  %v833_v32 = vmul.f32 %v831_v4, %v828_v29 }
  0xf5   : >> { %v825_v34 = vmul.f32 %v824_v26, %v820_v28 }
  0xf6   : >> { %v834_v35 = vsub.f32 %v832_v31, %v833_v32  ;;  %v2687_v42 = vmov %v811_v30  ;;  %760 = sbr.rel (!%p758_p11) target bundleno = 220 (0xdc), region = 335  ;;  %1305 = vst [vmem:[%s2445_s8 + $0x30] sm:$0xff] (%p758_p11), %v811_v30 }
  0xf7   : >> { %v826_v36 = vadd.f32 %v2062_v41, %v825_v34  }
  0xf8   : >> { %v839_v37 = vmul.f32 %v838_v33, %v834_v35 }
  0xf9   : >> { %v2686_v41 = vmov %v826_v36  ;;  %1308 = vst [vmem:[%s2445_s8 + $0x38] sm:$0xff] (%p758_p11), %v826_v36 }
  0xfa   : >> { %v840_v38 = vadd.f32 %v2058_v40, %v839_v37  }
  0xfc   : >> { %v2685_v40 = vmov %v840_v38  ;;  %1311 = vst [vmem:[%s2445_s8 + $0x40] sm:$0xff] (%p758_p11), %v840_v38 }
  0xfd PF: > { %s1337_s30 = smul.u32 9, %s1934_s12  ;;  %s917_s27 = sshll.u32 %s2445_s8, 4  ;;  %s2600_s27 = int_to_ptr.vmem [resolvable:$true] %s917_s27 }
  0xfe   : > { %s1338_s29 = smul.u32 18, %s1938_s13  ;;  %s902_s6 = scalar_lea.sflag [#allocation5], %s2432_s5 }
  0xff   : > { %s1712_s22 = scalar_lea.vmem %s2600_s27, 1152  ;;  %s2098_s12 = smov [#allocation4]  }
 0x100   : > { %s914_s17 = sadd.s32 %s1338_s29, %s1337_s30  ;;  %p1713_p12 = scmp.ne.s32.totalorder %s2600_s27, %s1712_s22 }
 0x101   : > { %s1328_s18 = sshll.u32 %s914_s17, 7  ;;  %s1716_s13 = sshll.u32 %s2098_s12, 4  ;;  %s1717_s13 = int_to_ptr.vmem [resolvable:$false] %s1716_s13 }
 0x102   : > { %s2605_s25 = scalar_lea.hbm %s2661_s2, %s1328_s18  ;;  %p1714_p13 = pnand %p1713_p12, %p2176_p8 }
 0x103   : > { %s1718_s8 = scalar_lea.vmem %s1717_s13, 2304  ;;  %p1719_p1 = scmp.lt.s32.totalorder %s2600_s27, %s1717_s13 }
 0x104   : > { %p1715_p0 = pneg %p1714_p13  ;;  %p1720_p2 = scmp.lt.s32.totalorder %s1718_s8, %s1712_s22 }
 0x106   : > { %p1721_p4 = por %p1720_p2, %p1719_p1 }
 0x108   : > { %p1722_p5 = pnand %p1721_p4, %p1715_p0 }
 0x10a   : > { %1725 = shalt.err (!%p1722_p5)
}
 0x10b   : > { %s1726_s26 = scalar_lea.hbm %s2605_s25, 1152  ;;  %s1730_s30 = scalar_lea.hbm %s2661_s2, 4608 }
 0x10c   : > { %p1727_p6 = scmp.ne.s32.totalorder %s2605_s25, %s1726_s26  ;;  %p1731_p10 = scmp.lt.u32.totalorder %s2605_s25, %s2661_s2 }
 0x10d   : > { %p1732_p11 = scmp.lt.u32.totalorder %s1730_s30, %s1726_s26  ;;  %p1734_p13 = scmp.lt.u32.totalorder %s1726_s26, %s2605_s25 }
 0x10e   : > { %p1728_p7 = pnand %p1727_p6, %p2176_p8 }
 0x10f   : > { %p1733_p12 = por %p1732_p11, %p1731_p10 }
 0x110   : > { %p1729_p3 = pneg %p1728_p7 }
 0x111   : > { %p1735_p0 = por %p1734_p13, %p1733_p12 }
 0x113   : > { %p1736_p1 = pnand %p1735_p0, %p1729_p3 }
 0x115   : > { %1739 = shalt.err (!%p1736_p1)
}
 0x116   : > { %s2099_s18 = smov 128   ;;  %s2100_s4 = smov 8  }
 0x117   : > { %1339 = dma.vmem_to_hbm [thread:$0]  (%p2176_p8), %s2600_s27, 1152, %s2605_s25, %s902_s6, %s2099_s18, %s2099_s18, %s2100_s4  }
 0x118 PF: > { %p1345_p2 = scmp.ge.s32.totalorder %s1950_s16, 2  ;;  %s932_s21 = sand.u32 1, %s1922_s9  }
 0x119   : > { %s933_s22 = scalar_lea.sflag [#allocation5], %s932_s21 }
 0x11a   : > { %p1342_p4 = pnand %p1345_p2, %p2180_p9 }
 0x11c   : > { %1917 = dma.done.wait (!%p1342_p4), %s933_s22, 1152  }
 0x11d   : > { %1919 = vsyncadd (!%p1342_p4), %s933_s22, 4294966144  ;;  %s15_s16 = sadd.s32 1, %s1950_s16   ;;  %s2694_s9 = smov %s1926_s10 }
 0x11e   : > { %p12_p5 = scmp.ge.s32.totalorder %s15_s16, 6   ;;  %s2695_s10 = smov %s1930_s11 }
 0x11f   : > { %s2696_s11 = smov %s2188_s28  ;;  %s2697_s12 = smov %s1942_s14 }
 0x120   : > { %s2698_s13 = smov %s1946_s15  ;;  %s2699_s14 = smov %s2702_s19 }
 0x121   : > { %s2700_s15 = smov %s2706_s20  ;;  %14 = sbr.rel (!%p12_p5) target bundleno = 5 (0x5), region = 346 }
 0x128   :  { %938 = vsyncpa [#allocation5], 1 }
 0x129   :  { %940 = vsyncpa [#allocation5 + $0x1], 1 }

</bundles_post_ra>
